<compile_context>
chip_gen: v6e
topology: v6e:2x2x1
jax: 0.10.0
libtpu: 0.0.40
codegen_flags: <defaults>
</compile_context>

<pallas_src>
import jax
import jax.numpy as jnp
from jax import lax
from jax.experimental import pallas as pl
from jax.experimental.pallas import tpu as pltpu

# ----------------------------- config ---------------------------------------
B = 2                 # batch
D = H = W = 16        # small 3D volume
DHW = D * H * W       # 4096 voxels per sample
N_VOX = B * DHW       # 8192 voxels total (lane axis of the stem matmul)
KVOL = 27             # 3x3x3 patch taps
KPAD = 32             # taps padded to a sublane/bf16-friendly multiple
C_STEM = 32           # stem channels of the stand-in feature extractor
FEAT = 512            # resnet34 feature width (fc.in_features)
HID = 256             # classifier head hidden width
NUM_CLASSES = 3
BN_EPS = 1e-5


# --------------------- fused stem + head kernel (grid of 1) ------------------
def fused_kernel(p_ref, ws_ref, bs_ref, we_ref, be_ref, w2_ref, b2_ref, o_ref):
    """Fused stand-in backbone + classifier head, everything VMEM resident.

    p_ref : [KPAD, N_VOX]       bf16  im2col patches (taps x voxels, lane dense)
    ws_ref: [C_STEM, KPAD]      bf16  stem conv weight (transposed, zero padded)
    bs_ref: [C_STEM, 1]         f32   stem bias
    we_ref: [HID, C_STEM]       f32   folded (w_proj @ (w1 * bn_scale)).T
    be_ref: [HID, 1]            f32   folded bias (b_proj/w1/BN collapsed)
    w2_ref: [NUM_CLASSES, HID]  f32   final linear weight (transposed)
    b2_ref: [NUM_CLASSES, 1]    f32   final linear bias
    o_ref : [NUM_CLASSES, B]    f32   logits (transposed back in the wrapper)
    """
    # 3x3x3 conv stem as one MXU matmul (bf16 operands, f32 accumulate) + ReLU.
    stem = jnp.dot(ws_ref[...], p_ref[...],
                   preferred_element_type=jnp.float32)              # [C_STEM, N_VOX]
    stem = jnp.maximum(stem + bs_ref[...], 0.0)

    # Global average pool per batch element: lane reductions over aligned
    # 4096-lane slices; results placed into a [C_STEM, B] tile with an iota
    # mask (avoids unaligned minor-dim concatenation).
    col = lax.broadcasted_iota(jnp.int32, (C_STEM, B), 1)
    pooled = jnp.zeros((C_STEM, B), jnp.float32)
    for b in range(B):
        s_b = jnp.sum(stem[:, b * DHW:(b + 1) * DHW], axis=1, keepdims=True)
        pooled = jnp.where(col == b, jnp.broadcast_to(s_b, (C_STEM, B)), pooled)
    pooled = pooled * (1.0 / DHW)                                    # [C_STEM, B]

    # Folded projection + Linear(512,256) + BatchNorm1d (inference) + ReLU.
    h = jnp.dot(we_ref[...], pooled, preferred_element_type=jnp.float32)
    h = jnp.maximum(h + be_ref[...], 0.0)                            # [HID, B]
    # Dropout(0.5): identity at inference.
    # Linear(256, num_classes).
    o_ref[...] = (jnp.dot(w2_ref[...], h, preferred_element_type=jnp.float32)
                  + b2_ref[...])                                     # [NUM_CLASSES, B]


# ------------------------------ glue -----------------------------------------
def im2col_3d_t(x):
    """x: [B, D, H, W] f32 -> [KPAD, B*D*H*W] bf16 patches (taps x voxels)."""
    xb = x.astype(jnp.bfloat16)                      # bf16 MXU operands only
    xp = jnp.pad(xb, ((0, 0), (1, 1), (1, 1), (1, 1)))
    cols = [xp[:, dz:dz + D, dy:dy + H, dx:dx + W].reshape(N_VOX)
            for dz in range(3) for dy in range(3) for dx in range(3)]
    cols += [jnp.zeros((N_VOX,), jnp.bfloat16)] * (KPAD - KVOL)
    return jnp.stack(cols, axis=0)                   # [KPAD, N_VOX]


def _stem_weight_t(params):
    return jnp.pad(params["w_stem"].T,
                   ((0, 0), (0, KPAD - KVOL))).astype(jnp.bfloat16)  # [C_STEM, KPAD]


@jax.jit
def ct_classifier_forward(x, params):
    # x: [B, 1, D, H, W]  (PyTorch NCDHW, single channel)
    patches_t = im2col_3d_t(x[:, 0])                                 # [KPAD, N_VOX]

    # Param prep (tiny XLA matmuls): fold projection -> Linear(512,256) ->
    # BatchNorm1d (inference) into one affine map  pooled @ w_eff + b_eff.
    # Exact for inference-mode BN / dropout-off semantics.
    bn_scale = params["bn_gamma"] * lax.rsqrt(params["bn_var"] + BN_EPS)   # [1, HID]
    w1s = params["w1"] * bn_scale                                          # [FEAT, HID]
    w_eff = params["w_proj"] @ w1s                                         # [C_STEM, HID]
    b_eff = (params["b_proj"] @ w1s
             + (params["b1"] - params["bn_mean"]) * bn_scale
             + params["bn_beta"])                                          # [1, HID]

    vmem_specs = [pl.BlockSpec(memory_space=pltpu.MemorySpace.VMEM)
                  for _ in range(7)]
    logits_t = pl.pallas_call(
        fused_kernel,
        out_shape=jax.ShapeDtypeStruct((NUM_CLASSES, B), jnp.float32),
        in_specs=vmem_specs,
        out_specs=pl.BlockSpec(memory_space=pltpu.MemorySpace.VMEM),
    )(patches_t,
      _stem_weight_t(params),          # [C_STEM, KPAD]  bf16
      params["b_stem"].T,              # [C_STEM, 1]
      w_eff.T,                         # [HID, C_STEM]
      b_eff.T,                         # [HID, 1]
      params["w2"].T,                  # [NUM_CLASSES, HID]
      params["b2"].T)                  # [NUM_CLASSES, 1]
    return logits_t.T                                                 # [B, NUM_CLASSES]


def reference_forward(x, params):
    """Pure-JAX reference (unfused head; stem uses the same bf16 MXU operands
    as the kernel so operand precision matches)."""
    patches_t = im2col_3d_t(x[:, 0])
    stem = jnp.maximum(
        jnp.dot(_stem_weight_t(params), patches_t,
                preferred_element_type=jnp.float32) + params["b_stem"].T, 0.0)
    pooled = stem.reshape(C_STEM, B, DHW).mean(axis=2).T              # [B, C_STEM]
    feat = pooled @ params["w_proj"] + params["b_proj"]
    z = feat @ params["w1"] + params["b1"]
    z = (z - params["bn_mean"]) / jnp.sqrt(params["bn_var"] + BN_EPS) \
        * params["bn_gamma"] + params["bn_beta"]
    z = jnp.maximum(z, 0.0)
    return z @ params["w2"] + params["b2"]


def init_params(key):
    ks = jax.random.split(key, 8)
    return {
        # stand-in feature-extractor stem + projection
        "w_stem": jax.random.normal(ks[0], (KVOL, C_STEM), jnp.float32) * 0.1,
        "b_stem": jax.random.normal(ks[1], (1, C_STEM), jnp.float32) * 0.01,
        "w_proj": jax.random.normal(ks[2], (C_STEM, FEAT), jnp.float32) * 0.05,
        "b_proj": jax.random.normal(ks[3], (1, FEAT), jnp.float32) * 0.01,
        # classifier_head: Linear(512,256) -> BN(256) -> ReLU -> Dropout -> Linear(256,NC)
        "w1": jax.random.normal(ks[4], (FEAT, HID), jnp.float32) * 0.05,
        "b1": jax.random.normal(ks[5], (1, HID), jnp.float32) * 0.01,
        "bn_gamma": jnp.ones((1, HID), jnp.float32),
        "bn_beta": jnp.zeros((1, HID), jnp.float32),
        "bn_mean": jnp.zeros((1, HID), jnp.float32),
        "bn_var": jnp.ones((1, HID), jnp.float32),
        "w2": jax.random.normal(ks[6], (HID, NUM_CLASSES), jnp.float32) * 0.05,
        "b2": jax.random.normal(ks[7], (1, NUM_CLASSES), jnp.float32) * 0.01,
    }


if __name__ == "__main__":
    key = jax.random.PRNGKey(0)
    k_x, k_p = jax.random.split(key)
    x = jax.random.normal(k_x, (B, 1, D, H, W), jnp.float32)   # NCDHW, 1 channel
    params = init_params(k_p)

    out = ct_classifier_forward(x, params)
    out = jax.block_until_ready(out)

    ref = reference_forward(x, params)
    assert out.shape == (B, NUM_CLASSES)
    assert jnp.allclose(out, ref, atol=1e-3, rtol=1e-3), \
        f"mismatch:\n{out}\nvs\n{ref}"

    print("KERNEL_OK")
</pallas_src>

<mosaic_0001>
module attributes {stable_mosaic.version = 11 : i64} {
  func.func @fused_kernel(%arg0: memref<32x8192xbf16, #tpu.memory_space<vmem>>, %arg1: memref<32x32xbf16, #tpu.memory_space<vmem>>, %arg2: memref<32x1xf32, #tpu.memory_space<vmem>>, %arg3: memref<256x32xf32, #tpu.memory_space<vmem>>, %arg4: memref<256x1xf32, #tpu.memory_space<vmem>>, %arg5: memref<3x256xf32, #tpu.memory_space<vmem>>, %arg6: memref<3x1xf32, #tpu.memory_space<vmem>>, %arg7: memref<3x2xf32, #tpu.memory_space<vmem>>) attributes {dimension_semantics = [], scalar_prefetch = 0 : i64, scratch_operands = 0 : i64, tpu.core_type = #tpu.core_type<tc>} {
    %c0 = arith.constant 0 : index
    %c0_0 = arith.constant 0 : index
    %0 = vector.load %arg1[%c0, %c0_0] : memref<32x32xbf16, #tpu.memory_space<vmem>>, vector<32x32xbf16>
    %c0_1 = arith.constant 0 : index
    %c0_2 = arith.constant 0 : index
    %1 = vector.load %arg0[%c0_1, %c0_2] : memref<32x8192xbf16, #tpu.memory_space<vmem>>, vector<32x8192xbf16>
    %cst = arith.constant dense<0.000000e+00> : vector<32x8192xf32>
    %2 = tpu.matmul %0, %1, %cst {dimension_numbers = #tpu.dot_dimension_numbers<[1], [0], [0], [1], [0, 0, 1, 1], [], []>} : vector<32x32xbf16>, vector<32x8192xbf16>, vector<32x8192xf32> -> vector<32x8192xf32>
    %c0_3 = arith.constant 0 : index
    %c0_4 = arith.constant 0 : index
    %3 = vector.load %arg2[%c0_3, %c0_4] : memref<32x1xf32, #tpu.memory_space<vmem>>, vector<32x1xf32>
    %4 = vector.broadcast %3 : vector<32x1xf32> to vector<32x8192xf32>
    %5 = arith.addf %2, %4 : vector<32x8192xf32>
    %cst_5 = arith.constant 0.000000e+00 : f32
    %6 = vector.broadcast %cst_5 : f32 to vector<32x8192xf32>
    %7 = arith.maximumf %5, %6 : vector<32x8192xf32>
    %8 = tpu.iota {dimensions = array<i32: 1>} : vector<32x2xi32>
    %cst_6 = arith.constant 0.000000e+00 : f32
    %9 = vector.broadcast %cst_6 : f32 to vector<32x2xf32>
    %10 = vector.extract_strided_slice %7 {offsets = [0, 0], sizes = [32, 4096], strides = [1, 1]} : vector<32x8192xf32> to vector<32x4096xf32>
    %cst_7 = arith.constant dense<0.000000e+00> : vector<32xf32>
    %11 = vector.multi_reduction <add>, %10, %cst_7 [1] : vector<32x4096xf32> to vector<32xf32>
    %12 = vector.shape_cast %11 : vector<32xf32> to vector<32x1xf32>
    %c0_i32 = arith.constant 0 : i32
    %13 = vector.broadcast %c0_i32 : i32 to vector<32x2xi32>
    %14 = arith.cmpi eq, %8, %13 : vector<32x2xi32>
    %15 = vector.shape_cast %12 : vector<32x1xf32> to vector<32x1xf32>
    %16 = vector.broadcast %15 : vector<32x1xf32> to vector<32x2xf32>
    %17 = arith.select %14, %16, %9 : vector<32x2xi1>, vector<32x2xf32>
    %18 = vector.extract_strided_slice %7 {offsets = [0, 4096], sizes = [32, 4096], strides = [1, 1]} : vector<32x8192xf32> to vector<32x4096xf32>
    %cst_8 = arith.constant dense<0.000000e+00> : vector<32xf32>
    %19 = vector.multi_reduction <add>, %18, %cst_8 [1] : vector<32x4096xf32> to vector<32xf32>
    %20 = vector.shape_cast %19 : vector<32xf32> to vector<32x1xf32>
    %c1_i32 = arith.constant 1 : i32
    %21 = vector.broadcast %c1_i32 : i32 to vector<32x2xi32>
    %22 = arith.cmpi eq, %8, %21 : vector<32x2xi32>
    %23 = vector.shape_cast %20 : vector<32x1xf32> to vector<32x1xf32>
    %24 = vector.broadcast %23 : vector<32x1xf32> to vector<32x2xf32>
    %25 = arith.select %22, %24, %17 : vector<32x2xi1>, vector<32x2xf32>
    %cst_9 = arith.constant 2.44140625E-4 : f32
    %26 = vector.broadcast %cst_9 : f32 to vector<32x2xf32>
    %27 = arith.mulf %25, %26 : vector<32x2xf32>
    %c0_10 = arith.constant 0 : index
    %c0_11 = arith.constant 0 : index
    %28 = vector.load %arg3[%c0_10, %c0_11] : memref<256x32xf32, #tpu.memory_space<vmem>>, vector<256x32xf32>
    %cst_12 = arith.constant dense<0.000000e+00> : vector<256x2xf32>
    %29 = tpu.matmul %28, %27, %cst_12 {dimension_numbers = #tpu.dot_dimension_numbers<[1], [0], [0], [1], [0, 0, 1, 1], [], []>} : vector<256x32xf32>, vector<32x2xf32>, vector<256x2xf32> -> vector<256x2xf32>
    %c0_13 = arith.constant 0 : index
    %c0_14 = arith.constant 0 : index
    %30 = vector.load %arg4[%c0_13, %c0_14] : memref<256x1xf32, #tpu.memory_space<vmem>>, vector<256x1xf32>
    %31 = vector.broadcast %30 : vector<256x1xf32> to vector<256x2xf32>
    %32 = arith.addf %29, %31 : vector<256x2xf32>
    %cst_15 = arith.constant 0.000000e+00 : f32
    %33 = vector.broadcast %cst_15 : f32 to vector<256x2xf32>
    %34 = arith.maximumf %32, %33 : vector<256x2xf32>
    %c0_16 = arith.constant 0 : index
    %c0_17 = arith.constant 0 : index
    %35 = vector.load %arg5[%c0_16, %c0_17] : memref<3x256xf32, #tpu.memory_space<vmem>>, vector<3x256xf32>
    %cst_18 = arith.constant dense<0.000000e+00> : vector<3x2xf32>
    %36 = tpu.matmul %35, %34, %cst_18 {dimension_numbers = #tpu.dot_dimension_numbers<[1], [0], [0], [1], [0, 0, 1, 1], [], []>} : vector<3x256xf32>, vector<256x2xf32>, vector<3x2xf32> -> vector<3x2xf32>
    %c0_19 = arith.constant 0 : index
    %c0_20 = arith.constant 0 : index
    %37 = vector.load %arg6[%c0_19, %c0_20] : memref<3x1xf32, #tpu.memory_space<vmem>>, vector<3x1xf32>
    %38 = vector.broadcast %37 : vector<3x1xf32> to vector<3x2xf32>
    %39 = arith.addf %36, %38 : vector<3x2xf32>
    %c0_21 = arith.constant 0 : index
    %c0_22 = arith.constant 0 : index
    %40 = vector.load %arg7[%c0_21, %c0_22] : memref<3x2xf32, #tpu.memory_space<vmem>>, vector<3x2xf32>
    tpu.vector_store %arg7[%c0_21, %c0_22], %39 {strides = array<i32>} : memref<3x2xf32, #tpu.memory_space<vmem>>, vector<3x2xf32>,
    return
  }
}

</mosaic_0001>

<bundles_post_ra>
// kernel: ct_classifier_forward.1
= control target key start
LH: loop header
LB: loop body
LE: loop exit
PB: predicated region body
PF: predicated region fallthrough
CT: control target
= control target key end

     0   :  { %v4100_v3 = vmov 0   ;;  %vm833_vm0 = vcmask 261120   ;;  %vm3729_vm3 = vcmask 10240   ;;  %s5736_s0 = inlined_call_operand.vmem [shape: bf16[32,8192], index: 0, kind: input, shape index: {}]   ;;  %s5737_s1 = inlined_call_operand.vmem [shape: bf16[32,32], index: 1, kind: input, shape index: {}]   ;;  %s5738_s2 = inlined_call_operand.vmem [shape: f32[32,1], index: 2, kind: input, shape index: {}]   ;;  %s5739_s4 = inlined_call_operand.vmem [shape: f32[256,1], index: 4, kind: input, shape index: {}]   ;;  %s5740_s3 = inlined_call_operand.vmem [shape: f32[256,32], index: 3, kind: input, shape index: {}]   ;;  %s5741_s6 = inlined_call_operand.vmem [shape: f32[3,1], index: 6, kind: input, shape index: {}]   ;;  %s5742_s5 = inlined_call_operand.vmem [shape: f32[3,256], index: 5, kind: input, shape index: {}]   ;;  %s5743_s7 = inlined_call_operand.vmem [shape: f32[3,2], index: 7, kind: output, shape index: {}]  }
   0x1   :  { %v95_v0 = vld [vmem:[%s5736_s0 + $0x200] sm:$0xff]  ;;  %v97_v2 = vld [vmem:[%s5736_s0 + $0x210] sm:$0xff]  ;;  %872 = vmatprep.mubr.bf16.mxu1 %v4100_v3  ;;  %978 = vmatprep.mubr.bf16.mxu0 %v4100_v3  ;;  %v96_v19 = vld [vmem:[%s5736_s0 + $0x208] sm:$0xff] }
   0x2   :  { %v127_v1 = vld [vmem:[%s5736_s0 + $0x300] sm:$0xff]  ;;  %v129_v5 = vld [vmem:[%s5736_s0 + $0x310] sm:$0xff]  ;;  %4094 = vset.pattern.permute.xlu1 %v4100_v3  ;;  %4093 = vset.pattern.permute.xlu0 %v4100_v3  ;;  %v128_v20 = vld [vmem:[%s5736_s0 + $0x308] sm:$0xff] }
   0x3   :  { %v3802_v4 = vcombine.high %v95_v0, %v127_v1  ;;  %v3801_v6 = vcombine.low %v95_v0, %v127_v1  ;;  %v31_v7 = vld [vmem:[%s5736_s0] sm:$0xff]  ;;  %v3806_v9 = vcombine.high %v97_v2, %v129_v5  ;;  %v4163_v10 = vcombine.low %v97_v2, %v129_v5  ;;  %v33_v12 = vld [vmem:[%s5736_s0 + $0x10] sm:$0xff]  ;;  %v32_v27 = vld [vmem:[%s5736_s0 + $0x8] sm:$0xff] }
   0x4   :  { %v63_v8 = vld [vmem:[%s5736_s0 + $0x100] sm:$0xff]  ;;  %v65_v13 = vld [vmem:[%s5736_s0 + $0x110] sm:$0xff]  ;;  %v3804_v22 = vcombine.high %v96_v19, %v128_v20  ;;  %v3803_v26 = vcombine.low %v96_v19, %v128_v20  ;;  %v64_v28 = vld [vmem:[%s5736_s0 + $0x108] sm:$0xff] }
   0x5   :  { %v3738_v11 = vcombine.high %v31_v7, %v63_v8  ;;  %852 = vmatprep.subr.bf16.mxu1 %v3802_v4  ;;  %v4171_v14 = vcombine.high %v33_v12, %v65_v13  ;;  %v99_v15 = vld [vmem:[%s5736_s0 + $0x220] sm:$0xff]  ;;  %958 = vmatprep.subr.bf16.mxu0 %v3806_v9  ;;  %v3737_v16 = vcombine.low %v31_v7, %v63_v8  ;;  %v101_v32 = vld [vmem:[%s5736_s0 + $0x230] sm:$0xff]  ;;  %v4222_v36 = vld [vmem:[%s5737_s1 + $0x8] sm:$0xff]  }
   0x6   :  { %853 = vmatpush1.bf16.msra.mxu1 %v3801_v6  ;;  %v131_v17 = vld [vmem:[%s5736_s0 + $0x320] sm:$0xff]  ;;  %959 = vmatpush1.bf16.msra.mxu0 %v4163_v10  ;;  %v4180_v18 = vcombine.low %v33_v12, %v65_v13  ;;  %v3740_v31 = vcombine.high %v32_v27, %v64_v28  ;;  %v133_v33 = vld [vmem:[%s5736_s0 + $0x330] sm:$0xff]  ;;  %v3739_v34 = vcombine.low %v32_v27, %v64_v28  ;;  %v160_v40 = vld [vmem:[%s5738_s2 + $0x8] sm:$0xff] }
   0x7   :  { %854 = vmatprep.subr.bf16.mxu1 %v3738_v11  ;;  %960 = vmatprep.subr.bf16.mxu0 %v4171_v14  ;;  %v3810_v21 = vcombine.high %v99_v15, %v131_v17  ;;  %v4192_v23 = vld [vmem:[%s5737_s1] sm:$0xff]   ;;  %v3809_v29 = vcombine.low %v99_v15, %v131_v17  ;;  %v3814_v37 = vcombine.high %v101_v32, %v133_v33  ;;  %v37_v38 = vld [vmem:[%s5736_s0 + $0x30] sm:$0xff]  ;;  %v162_v42 = vld [vmem:[%s5738_s2 + $0x18] sm:$0xff] }
   0x8   :  { %v35_v24 = vld [vmem:[%s5736_s0 + $0x20] sm:$0xff]  ;;  %v69_v39 = vld [vmem:[%s5736_s0 + $0x130] sm:$0xff]  ;;  %170 = vperm.xlu1 %4094, %v160_v40   ;;  %v3813_v41 = vcombine.low %v101_v32, %v133_v33  ;;  %180 = vperm.xlu0 %4093, %v162_v42   ;;  %v98_v50 = vld [vmem:[%s5736_s0 + $0x218] sm:$0xff] }
   0x9   :  { %v67_v25 = vld [vmem:[%s5736_s0 + $0x120] sm:$0xff]  ;;  %v3750_v43 = vcombine.high %v37_v38, %v69_v39  ;;  %v161_v47 = vld [vmem:[%s5738_s2 + $0x10] sm:$0xff]  ;;  %v3749_v48 = vcombine.low %v37_v38, %v69_v39  ;;  %v130_v51 = vld [vmem:[%s5736_s0 + $0x318] sm:$0xff] }
   0xa   :  { %855 = vmatpush1.bf16.msra.mxu1 %v3737_v16  ;;  %961 = vmatpush1.bf16.msra.mxu0 %v4180_v18  ;;  %v3746_v30 = vcombine.high %v35_v24, %v67_v25  ;;  %v3745_v35 = vcombine.low %v35_v24, %v67_v25  ;;  %v103_v44 = vld [vmem:[%s5736_s0 + $0x240] sm:$0xff]  ;;  %v3808_v52 = vcombine.high %v98_v50, %v130_v51  ;;  %v105_v57 = vld [vmem:[%s5736_s0 + $0x250] sm:$0xff]  ;;  %v34_v60 = vld [vmem:[%s5736_s0 + $0x18] sm:$0xff] }
   0xb   :  { %905 = vmatprep.subr.bf16.mxu1 %v3804_v22  ;;  %1064 = vmatprep.subr.bf16.mxu0 %v3810_v21  ;;  %v135_v45 = vld [vmem:[%s5736_s0 + $0x340] sm:$0xff]  ;;  %v137_v58 = vld [vmem:[%s5736_s0 + $0x350] sm:$0xff]  ;;  %v66_v61 = vld [vmem:[%s5736_s0 + $0x118] sm:$0xff]  ;;  %v3807_v63 = vcombine.low %v98_v50, %v130_v51 }
   0xc   :  { %v159_v46 = vld [vmem:[%s5738_s2] sm:$0xff]  ;;  %v3818_v49 = vcombine.high %v103_v44, %v135_v45  ;;  %175 = vperm.xlu0 %4093, %v161_v47   ;;  %v3817_v55 = vcombine.low %v103_v44, %v135_v45  ;;  %v3822_v62 = vcombine.high %v105_v57, %v137_v58  ;;  %v3744_v0 = vcombine.high %v34_v60, %v66_v61  ;;  %v100_v1 = vld [vmem:[%s5736_s0 + $0x228] sm:$0xff]  ;;  %v102_v13 = vld [vmem:[%s5736_s0 + $0x238] sm:$0xff] }
   0xd   :  { %3865 = vmatmul.mubr.msk.bf16.vlgmr.msra.gmra.mxu1 %vm833_vm0, %v4192_v23  ;;  %3869 = vmatmul.mubr.msk.bf16.vlgmr.msra.gmra.mxu0 %vm833_vm0, %v4192_v23  ;;  %v39_v53 = vld [vmem:[%s5736_s0 + $0x40] sm:$0xff]  ;;  %v132_v2 = vld [vmem:[%s5736_s0 + $0x328] sm:$0xff]  ;;  %v3743_v4 = vcombine.low %v34_v60, %v66_v61  ;;  %v3821_v11 = vcombine.low %v105_v57, %v137_v58  ;;  %v38_v22 = vld [vmem:[%s5736_s0 + $0x38] sm:$0xff] }
   0xe   :  { %906 = vmatpush1.bf16.msra.mxu1 %v3803_v26  ;;  %1065 = vmatpush1.bf16.msra.mxu0 %v3809_v29  ;;  %v71_v54 = vld [vmem:[%s5736_s0 + $0x140] sm:$0xff]  ;;  %v3812_v5 = vcombine.high %v100_v1, %v132_v2  ;;  %v36_v6 = vld [vmem:[%s5736_s0 + $0x28] sm:$0xff]  ;;  %v3811_v8 = vcombine.low %v100_v1, %v132_v2  ;;  %v70_v24 = vld [vmem:[%s5736_s0 + $0x138] sm:$0xff] }
   0xf   :  { %882 = vmatprep.mubr.bf16.mxu1 %v4100_v3  ;;  %1066 = vmatprep.subr.bf16.mxu0 %v3746_v30  ;;  %v3754_v56 = vcombine.high %v39_v53, %v71_v54  ;;  %v3753_v59 = vcombine.low %v39_v53, %v71_v54  ;;  %v68_v7 = vld [vmem:[%s5736_s0 + $0x128] sm:$0xff]  ;;  %v107_v17 = vld [vmem:[%s5736_s0 + $0x260] sm:$0xff]  ;;  %v3752_v29 = vcombine.high %v38_v22, %v70_v24  ;;  %v77_v44 = vld [vmem:[%s5736_s0 + $0x170] sm:$0xff] }
  0x10   :  { %1084 = vmatprep.mubr.bf16.mxu0 %v4100_v3  ;;  %907 = vmatprep.subr.bf16.mxu1 %v3740_v31  ;;  %v3748_v12 = vcombine.high %v36_v6, %v68_v7  ;;  %v3747_v16 = vcombine.low %v36_v6, %v68_v7  ;;  %v43_v26 = vld [vmem:[%s5736_s0 + $0x60] sm:$0xff]  ;;  %v104_v30 = vld [vmem:[%s5736_s0 + $0x248] sm:$0xff]  ;;  %v3751_v33 = vcombine.low %v38_v22, %v70_v24  ;;  %v106_v47 = vld [vmem:[%s5736_s0 + $0x258] sm:$0xff] }
  0x11   :  { %165 = vperm.xlu1 %4094, %v159_v46   ;;  %v75_v27 = vld [vmem:[%s5736_s0 + $0x160] sm:$0xff]  ;;  %v136_v31 = vld [vmem:[%s5736_s0 + $0x348] sm:$0xff]  ;;  %v74_v57 = vld [vmem:[%s5736_s0 + $0x158] sm:$0xff] }
  0x12   :  { %908 = vmatpush1.bf16.msra.mxu1 %v3739_v34  ;;  %1067 = vmatpush1.bf16.msra.mxu0 %v3745_v35  ;;  %v3762_v32 = vcombine.high %v43_v26, %v75_v27  ;;  %v109_v34 = vld [vmem:[%s5736_s0 + $0x270] sm:$0xff]  ;;  %v3761_v38 = vcombine.low %v43_v26, %v75_v27  ;;  %v40_v40 = vld [vmem:[%s5736_s0 + $0x48] sm:$0xff]  ;;  %v3819_v42 = vcombine.low %v104_v30, %v136_v31  ;;  %v111_v51 = vld [vmem:[%s5736_s0 + $0x280] sm:$0xff] }
  0x13   :  { %4088 = vmatprep.subr.bf16.mxu1 %v3806_v9  ;;  %1170 = vmatprep.subr.bf16.mxu0 %v3814_v37  ;;  %v41_v9 = vld [vmem:[%s5736_s0 + $0x50] sm:$0xff]  ;;  %v3820_v37 = vcombine.high %v104_v30, %v136_v31  ;;  %v79_v60 = vld [vmem:[%s5736_s0 + $0x180] sm:$0xff]  ;;  %v46_v26 = vld [vmem:[%s5736_s0 + $0x78] sm:$0xff] }
  0x14   :  { %v141_v35 = vld [vmem:[%s5736_s0 + $0x370] sm:$0xff]  ;;  %v78_v27 = vld [vmem:[%s5736_s0 + $0x178] sm:$0xff]  ;;  %v83_v30 = vld [vmem:[%s5736_s0 + $0x1a0] sm:$0xff] }
  0x15   :  { %3866 = vmatmul.mubr.msk.bf16.gmra.mxu1 %vm833_vm0, %v4222_v36  ;;  %3873 = vmatmul.mubr.msk.bf16.vlgmr.msra.gmra.mxu0 %vm833_vm0, %v4192_v23  ;;  %v3830_v39 = vcombine.high %v109_v34, %v141_v35  ;;  %v3829_v45 = vcombine.low %v109_v34, %v141_v35  ;;  %v144_v34 = vld [vmem:[%s5736_s0 + $0x388] sm:$0xff] }
  0x16   :  { %925 = vmatprep.mubr.bf16.mxu1 %v4100_v3  ;;  %1094 = vmatprep.mubr.bf16.mxu0 %v4100_v3 }
  0x17   :  { %1171 = vmatpush1.bf16.msra.mxu0 %v3813_v41  ;;  %v72_v41 = vld [vmem:[%s5736_s0 + $0x148] sm:$0xff] }
  0x18   :  { %1172 = vmatprep.subr.bf16.mxu0 %v3750_v43  ;;  %v45_v43 = vld [vmem:[%s5736_s0 + $0x70] sm:$0xff]  ;;  %v3756_v46 = vcombine.high %v40_v40, %v72_v41  ;;  %v3755_v50 = vcombine.low %v40_v40, %v72_v41 }
  0x19   :  { %v3765_v54 = vcombine.low %v45_v43, %v77_v44 }
  0x1b   :  { %1173 = vmatpush1.bf16.msra.mxu0 %v3749_v48  ;;  %v138_v48 = vld [vmem:[%s5736_s0 + $0x358] sm:$0xff] }
  0x1c   :  { %1276 = vmatprep.subr.bf16.mxu0 %v3818_v49  ;;  %v3766_v49 = vcombine.high %v45_v43, %v77_v44  ;;  %v3824_v53 = vcombine.high %v106_v47, %v138_v48  ;;  %v3823_v58 = vcombine.low %v106_v47, %v138_v48  ;;  %v48_v43 = vld [vmem:[%s5736_s0 + $0x88] sm:$0xff]  ;;  %v85_v47 = vld [vmem:[%s5736_s0 + $0x1b0] sm:$0xff] }
  0x1d   :  { %3867 = vmatmul.mubr.msk.bf16.vlgmr.msra.gmra.mxu1 %vm833_vm0, %v4192_v23  ;;  %3874 = vmatmul.mubr.msk.bf16.gmra.mxu0 %vm833_vm0, %v4222_v36  ;;  %v80_v44 = vld [vmem:[%s5736_s0 + $0x188] sm:$0xff] }
  0x1e   :  { %4090 = vmatpush1.bf16.msra.mxu1 %v4163_v10  ;;  %935 = vmatprep.mubr.bf16.mxu1 %v4100_v3  ;;  %v73_v10 = vld [vmem:[%s5736_s0 + $0x150] sm:$0xff] }
  0x1f   :  { %1190 = vmatprep.mubr.bf16.mxu0 %v4100_v3  ;;  %4089 = vmatprep.subr.bf16.mxu1 %v4171_v14  ;;  %v134_v14 = vld [vmem:[%s5736_s0 + $0x338] sm:$0xff]  ;;  %v3758_v15 = vcombine.high %v41_v9, %v73_v10  ;;  %v3757_v20 = vcombine.low %v41_v9, %v73_v10  ;;  %v44_v9 = vld [vmem:[%s5736_s0 + $0x68] sm:$0xff] }
  0x20   :  { %v3816_v19 = vcombine.high %v102_v13, %v134_v14  ;;  %v3815_v25 = vcombine.low %v102_v13, %v134_v14  ;;  %v76_v10 = vld [vmem:[%s5736_s0 + $0x168] sm:$0xff]  ;;  %v81_v13 = vld [vmem:[%s5736_s0 + $0x190] sm:$0xff] }
  0x22   :  { %4091 = vmatpush1.bf16.msra.mxu1 %v4180_v18  ;;  %v139_v18 = vld [vmem:[%s5736_s0 + $0x360] sm:$0xff] }
  0x23   :  { %1011 = vmatprep.subr.bf16.mxu1 %v3808_v52  ;;  %v3826_v21 = vcombine.high %v107_v17, %v139_v18  ;;  %v3825_v28 = vcombine.low %v107_v17, %v139_v18  ;;  %v143_v52 = vld [vmem:[%s5736_s0 + $0x380] sm:$0xff]  ;;  %v142_v17 = vld [vmem:[%s5736_s0 + $0x378] sm:$0xff] }
  0x24   :  { %v3833_v61 = vcombine.low %v111_v51, %v143_v52 }
  0x25   :  { %3868 = vmatmul.mubr.msk.bf16.gmra.mxu1 %vm833_vm0, %v4222_v36  ;;  %3877 = vmatmul.mubr.msk.bf16.vlgmr.msra.gmra.mxu0 %vm833_vm0, %v4192_v23 }
  0x26   :  { %988 = vmatprep.mubr.bf16.mxu1 %v4100_v3  ;;  %1200 = vmatprep.mubr.bf16.mxu0 %v4100_v3 }
  0x27   :  { %1277 = vmatpush1.bf16.msra.mxu0 %v3817_v55  ;;  %v3834_v55 = vcombine.high %v111_v51, %v143_v52  ;;  %v146_v51 = vld [vmem:[%s5736_s0 + $0x398] sm:$0xff] }
  0x28   :  { %1278 = vmatprep.subr.bf16.mxu0 %v3754_v56  ;;  %v42_v56 = vld [vmem:[%s5736_s0 + $0x58] sm:$0xff] }
  0x29   :  { %v3759_v2 = vcombine.low %v42_v56, %v74_v57 }
  0x2b   :  { %1279 = vmatpush1.bf16.msra.mxu0 %v3753_v59  ;;  %v47_v59 = vld [vmem:[%s5736_s0 + $0x80] sm:$0xff] }
  0x2c   :  { %1382 = vmatprep.subr.bf16.mxu0 %v3822_v62  ;;  %v3760_v62 = vcombine.high %v42_v56, %v74_v57  ;;  %v3770_v1 = vcombine.high %v47_v59, %v79_v60  ;;  %v3769_v7 = vcombine.low %v47_v59, %v79_v60  ;;  %v50_v59 = vld [vmem:[%s5736_s0 + $0x98] sm:$0xff] }
  0x2d   :  { %3870 = vmatmul.mubr.msk.bf16.vlgmr.msra.gmra.mxu1 %vm833_vm0, %v4222_v36  ;;  %3878 = vmatmul.mubr.msk.bf16.gmra.mxu0 %vm833_vm0, %v4222_v36  ;;  %v82_v60 = vld [vmem:[%s5736_s0 + $0x198] sm:$0xff] }
  0x2e   :  { %1012 = vmatpush1.bf16.msra.mxu1 %v3807_v63  ;;  %1031 = vmatprep.mubr.bf16.mxu1 %v4100_v3  ;;  %v108_v63 = vld [vmem:[%s5736_s0 + $0x268] sm:$0xff] }
  0x2f   :  { %1013 = vmatprep.subr.bf16.mxu1 %v3744_v0  ;;  %1296 = vmatprep.mubr.bf16.mxu0 %v4100_v3  ;;  %v140_v0 = vld [vmem:[%s5736_s0 + $0x368] sm:$0xff] }
  0x30   :  { %v3828_v6 = vcombine.high %v108_v63, %v140_v0 }
  0x32   :  { %1014 = vmatpush1.bf16.msra.mxu1 %v3743_v4  ;;  %v113_v4 = vld [vmem:[%s5736_s0 + $0x290] sm:$0xff] }
  0x33   :  { %1117 = vmatprep.subr.bf16.mxu1 %v3812_v5  ;;  %v145_v5 = vld [vmem:[%s5736_s0 + $0x390] sm:$0xff] }
  0x34   :  { %v3837_v14 = vcombine.low %v113_v4, %v145_v5 }
  0x35   :  { %3871 = vmatmul.mubr.msk.bf16.vlgmr.msra.gmra.mxu1 %vm833_vm0, %v4192_v23  ;;  %3881 = vmatmul.mubr.msk.bf16.vlgmr.msra.gmra.mxu0 %vm833_vm0, %v4192_v23 }
  0x36   :  { %1118 = vmatpush1.bf16.msra.mxu1 %v3811_v8  ;;  %1041 = vmatprep.mubr.bf16.mxu1 %v4100_v3  ;;  %v3838_v8 = vcombine.high %v113_v4, %v145_v5  ;;  %v148_v4 = vld [vmem:[%s5736_s0 + $0x3a8] sm:$0xff] }
  0x37   :  { %1306 = vmatprep.mubr.bf16.mxu0 %v4100_v3  ;;  %1383 = vmatpush1.bf16.msra.mxu0 %v3821_v11  ;;  %v3827_v11 = vcombine.low %v108_v63, %v140_v0  ;;  %v87_v63 = vld [vmem:[%s5736_s0 + $0x1c0] sm:$0xff] }
  0x38   :  { %1119 = vmatprep.subr.bf16.mxu1 %v3748_v12  ;;  %1384 = vmatprep.subr.bf16.mxu0 %v3758_v15  ;;  %v49_v12 = vld [vmem:[%s5736_s0 + $0x90] sm:$0xff]  ;;  %v3764_v15 = vcombine.high %v44_v9, %v76_v10 }
  0x39   :  { %v3774_v18 = vcombine.high %v49_v12, %v81_v13  ;;  %v3773_v24 = vcombine.low %v49_v12, %v81_v13  ;;  %v52_v12 = vld [vmem:[%s5736_s0 + $0xa8] sm:$0xff] }
  0x3a   :  { %1120 = vmatpush1.bf16.msra.mxu1 %v3747_v16  ;;  %v110_v16 = vld [vmem:[%s5736_s0 + $0x278] sm:$0xff]  ;;  %v84_v13 = vld [vmem:[%s5736_s0 + $0x1a8] sm:$0xff] }
  0x3b   :  { %1223 = vmatprep.subr.bf16.mxu1 %v3816_v19  ;;  %1385 = vmatpush1.bf16.msra.mxu0 %v3757_v20  ;;  %v3763_v19 = vcombine.low %v44_v9, %v76_v10  ;;  %v115_v20 = vld [vmem:[%s5736_s0 + $0x2a0] sm:$0xff]  ;;  %v3832_v22 = vcombine.high %v110_v16, %v142_v17 }
  0x3c   :  { %1488 = vmatprep.subr.bf16.mxu0 %v3826_v21  ;;  %v147_v21 = vld [vmem:[%s5736_s0 + $0x3a0] sm:$0xff] }
  0x3d   :  { %3872 = vmatmul.mubr.msk.bf16.gmra.mxu1 %vm833_vm0, %v4222_v36  ;;  %3882 = vmatmul.mubr.msk.bf16.gmra.mxu0 %vm833_vm0, %v4222_v36  ;;  %v3841_v31 = vcombine.low %v115_v20, %v147_v21 }
  0x3e   :  { %1137 = vmatprep.mubr.bf16.mxu1 %v4100_v3  ;;  %1402 = vmatprep.mubr.bf16.mxu0 %v4100_v3 }
  0x45   :  { %3875 = vmatmul.mubr.msk.bf16.vlgmr.msra.gmra.mxu1 %vm833_vm0, %v4192_v23  ;;  %3885 = vmatmul.mubr.msk.bf16.vlgmr.msra.gmra.mxu0 %vm833_vm0, %v4192_v23 }
  0x46   :  { %1224 = vmatpush1.bf16.msra.mxu1 %v3815_v25  ;;  %1147 = vmatprep.mubr.bf16.mxu1 %v4100_v3  ;;  %v3842_v25 = vcombine.high %v115_v20, %v147_v21  ;;  %v150_v20 = vld [vmem:[%s5736_s0 + $0x3b8] sm:$0xff] }
  0x47   :  { %1412 = vmatprep.mubr.bf16.mxu0 %v4100_v3  ;;  %1489 = vmatpush1.bf16.msra.mxu0 %v3825_v28  ;;  %v3831_v28 = vcombine.low %v110_v16, %v142_v17  ;;  %v89_v16 = vld [vmem:[%s5736_s0 + $0x1d0] sm:$0xff] }
  0x48   :  { %1225 = vmatprep.subr.bf16.mxu1 %v3752_v29  ;;  %1490 = vmatprep.subr.bf16.mxu0 %v3762_v32  ;;  %v51_v29 = vld [vmem:[%s5736_s0 + $0xa0] sm:$0xff]  ;;  %v3768_v32 = vcombine.high %v46_v26, %v78_v27 }
  0x49   :  { %v3778_v35 = vcombine.high %v51_v29, %v83_v30  ;;  %v3777_v41 = vcombine.low %v51_v29, %v83_v30  ;;  %v54_v29 = vld [vmem:[%s5736_s0 + $0xb8] sm:$0xff] }
  0x4a   :  { %1226 = vmatpush1.bf16.msra.mxu1 %v3751_v33  ;;  %v112_v33 = vld [vmem:[%s5736_s0 + $0x288] sm:$0xff]  ;;  %v86_v30 = vld [vmem:[%s5736_s0 + $0x1b8] sm:$0xff] }
  0x4b   :  { %1329 = vmatprep.subr.bf16.mxu1 %v3820_v37  ;;  %1491 = vmatpush1.bf16.msra.mxu0 %v3761_v38  ;;  %v3767_v37 = vcombine.low %v46_v26, %v78_v27  ;;  %v117_v38 = vld [vmem:[%s5736_s0 + $0x2b0] sm:$0xff]  ;;  %v3836_v40 = vcombine.high %v112_v33, %v144_v34 }
  0x4c   :  { %1594 = vmatprep.subr.bf16.mxu0 %v3830_v39  ;;  %v149_v39 = vld [vmem:[%s5736_s0 + $0x3b0] sm:$0xff] }
  0x4d   :  { %3876 = vmatmul.mubr.msk.bf16.gmra.mxu1 %vm833_vm0, %v4222_v36  ;;  %3886 = vmatmul.mubr.msk.bf16.gmra.mxu0 %vm833_vm0, %v4222_v36  ;;  %v3845_v48 = vcombine.low %v117_v38, %v149_v39 }
  0x4e   :  { %1243 = vmatprep.mubr.bf16.mxu1 %v4100_v3  ;;  %1508 = vmatprep.mubr.bf16.mxu0 %v4100_v3 }
  0x55   :  { %3879 = vmatmul.mubr.msk.bf16.vlgmr.msra.gmra.mxu1 %vm833_vm0, %v4192_v23  ;;  %3889 = vmatmul.mubr.msk.bf16.vlgmr.msra.gmra.mxu0 %vm833_vm0, %v4192_v23 }
  0x56   :  { %1330 = vmatpush1.bf16.msra.mxu1 %v3819_v42  ;;  %1253 = vmatprep.mubr.bf16.mxu1 %v4100_v3  ;;  %v3846_v42 = vcombine.high %v117_v38, %v149_v39  ;;  %v152_v38 = vld [vmem:[%s5736_s0 + $0x3c8] sm:$0xff] }
  0x57   :  { %1518 = vmatprep.mubr.bf16.mxu0 %v4100_v3  ;;  %1595 = vmatpush1.bf16.msra.mxu0 %v3829_v45  ;;  %v3835_v45 = vcombine.low %v112_v33, %v144_v34  ;;  %v91_v33 = vld [vmem:[%s5736_s0 + $0x1e0] sm:$0xff] }
  0x58   :  { %1331 = vmatprep.subr.bf16.mxu1 %v3756_v46  ;;  %1596 = vmatprep.subr.bf16.mxu0 %v3766_v49  ;;  %v53_v46 = vld [vmem:[%s5736_s0 + $0xb0] sm:$0xff]  ;;  %v3772_v49 = vcombine.high %v48_v43, %v80_v44 }
  0x59   :  { %v3782_v52 = vcombine.high %v53_v46, %v85_v47  ;;  %v3781_v57 = vcombine.low %v53_v46, %v85_v47 }
  0x5a   :  { %1332 = vmatpush1.bf16.msra.mxu1 %v3755_v50  ;;  %v114_v50 = vld [vmem:[%s5736_s0 + $0x298] sm:$0xff] }
  0x5b   :  { %1435 = vmatprep.subr.bf16.mxu1 %v3824_v53  ;;  %1597 = vmatpush1.bf16.msra.mxu0 %v3765_v54  ;;  %v3771_v53 = vcombine.low %v48_v43, %v80_v44  ;;  %v119_v54 = vld [vmem:[%s5736_s0 + $0x2c0] sm:$0xff]  ;;  %v3840_v56 = vcombine.high %v114_v50, %v146_v51  ;;  %v157_v43 = vld [vmem:[%s5736_s0 + $0x3f0] sm:$0xff] }
  0x5c   :  { %1700 = vmatprep.subr.bf16.mxu0 %v3834_v55  ;;  %v151_v55 = vld [vmem:[%s5736_s0 + $0x3c0] sm:$0xff] }
  0x5d   :  { %3880 = vmatmul.mubr.msk.bf16.gmra.mxu1 %vm833_vm0, %v4222_v36  ;;  %3890 = vmatmul.mubr.msk.bf16.gmra.mxu0 %vm833_vm0, %v4222_v36  ;;  %v3849_v0 = vcombine.low %v119_v54, %v151_v55 }
  0x5e   :  { %1349 = vmatprep.mubr.bf16.mxu1 %v4100_v3  ;;  %1614 = vmatprep.mubr.bf16.mxu0 %v4100_v3 }
  0x65   :  { %3883 = vmatmul.mubr.msk.bf16.vlgmr.msra.gmra.mxu1 %vm833_vm0, %v4192_v23  ;;  %3893 = vmatmul.mubr.msk.bf16.vlgmr.msra.gmra.mxu0 %vm833_vm0, %v4192_v23 }
  0x66   :  { %1436 = vmatpush1.bf16.msra.mxu1 %v3823_v58  ;;  %1359 = vmatprep.mubr.bf16.mxu1 %v4100_v3  ;;  %v3850_v58 = vcombine.high %v119_v54, %v151_v55 }
  0x67   :  { %1624 = vmatprep.mubr.bf16.mxu0 %v4100_v3  ;;  %1701 = vmatpush1.bf16.msra.mxu0 %v3833_v61  ;;  %v3839_v61 = vcombine.low %v114_v50, %v146_v51 }
  0x68   :  { %1437 = vmatprep.subr.bf16.mxu1 %v3760_v62  ;;  %1702 = vmatprep.subr.bf16.mxu0 %v3770_v1  ;;  %v55_v62 = vld [vmem:[%s5736_s0 + $0xc0] sm:$0xff]  ;;  %v3776_v1 = vcombine.high %v50_v59, %v82_v60 }
  0x69   :  { %v3786_v5 = vcombine.high %v55_v62, %v87_v63  ;;  %v3785_v10 = vcombine.low %v55_v62, %v87_v63  ;;  %v61_v63 = vld [vmem:[%s5736_s0 + $0xf0] sm:$0xff] }
  0x6a   :  { %1438 = vmatpush1.bf16.msra.mxu1 %v3759_v2  ;;  %v116_v2 = vld [vmem:[%s5736_s0 + $0x2a8] sm:$0xff] }
  0x6b   :  { %1541 = vmatprep.subr.bf16.mxu1 %v3828_v6  ;;  %1703 = vmatpush1.bf16.msra.mxu0 %v3769_v7  ;;  %v3775_v6 = vcombine.low %v50_v59, %v82_v60  ;;  %v121_v7 = vld [vmem:[%s5736_s0 + $0x2d0] sm:$0xff]  ;;  %v3844_v9 = vcombine.high %v116_v2, %v148_v4 }
  0x6c   :  { %1806 = vmatprep.subr.bf16.mxu0 %v3838_v8  ;;  %v153_v8 = vld [vmem:[%s5736_s0 + $0x3d0] sm:$0xff] }
  0x6d   :  { %3884 = vmatmul.mubr.msk.bf16.gmra.mxu1 %vm833_vm0, %v4222_v36  ;;  %3894 = vmatmul.mubr.msk.bf16.gmra.mxu0 %vm833_vm0, %v4222_v36  ;;  %v3853_v17 = vcombine.low %v121_v7, %v153_v8 }
  0x6e   :  { %1455 = vmatprep.mubr.bf16.mxu1 %v4100_v3  ;;  %1720 = vmatprep.mubr.bf16.mxu0 %v4100_v3 }
  0x75   :  { %3887 = vmatmul.mubr.msk.bf16.vlgmr.msra.gmra.mxu1 %vm833_vm0, %v4192_v23  ;;  %3897 = vmatmul.mubr.msk.bf16.vlgmr.msra.gmra.mxu0 %vm833_vm0, %v4192_v23 }
  0x76   :  { %1542 = vmatpush1.bf16.msra.mxu1 %v3827_v11  ;;  %1465 = vmatprep.mubr.bf16.mxu1 %v4100_v3  ;;  %v3854_v11 = vcombine.high %v121_v7, %v153_v8 }
  0x77   :  { %1730 = vmatprep.mubr.bf16.mxu0 %v4100_v3  ;;  %1807 = vmatpush1.bf16.msra.mxu0 %v3837_v14  ;;  %v3843_v14 = vcombine.low %v116_v2, %v148_v4 }
  0x78   :  { %1543 = vmatprep.subr.bf16.mxu1 %v3764_v15  ;;  %1808 = vmatprep.subr.bf16.mxu0 %v3774_v18  ;;  %v57_v15 = vld [vmem:[%s5736_s0 + $0xd0] sm:$0xff]  ;;  %v3780_v18 = vcombine.high %v52_v12, %v84_v13 }
  0x79   :  { %v3790_v21 = vcombine.high %v57_v15, %v89_v16  ;;  %v3789_v27 = vcombine.low %v57_v15, %v89_v16 }
  0x7a   :  { %1544 = vmatpush1.bf16.msra.mxu1 %v3763_v19  ;;  %v118_v19 = vld [vmem:[%s5736_s0 + $0x2b8] sm:$0xff] }
  0x7b   :  { %1647 = vmatprep.subr.bf16.mxu1 %v3832_v22  ;;  %1809 = vmatpush1.bf16.msra.mxu0 %v3773_v24  ;;  %v3779_v22 = vcombine.low %v52_v12, %v84_v13  ;;  %v123_v24 = vld [vmem:[%s5736_s0 + $0x2e0] sm:$0xff]  ;;  %v3848_v26 = vcombine.high %v118_v19, %v150_v20 }
  0x7c   :  { %1912 = vmatprep.subr.bf16.mxu0 %v3842_v25  ;;  %v155_v25 = vld [vmem:[%s5736_s0 + $0x3e0] sm:$0xff] }
  0x7d   :  { %3888 = vmatmul.mubr.msk.bf16.gmra.mxu1 %vm833_vm0, %v4222_v36  ;;  %3898 = vmatmul.mubr.msk.bf16.gmra.mxu0 %vm833_vm0, %v4222_v36  ;;  %v3857_v34 = vcombine.low %v123_v24, %v155_v25 }
  0x7e   :  { %1561 = vmatprep.mubr.bf16.mxu1 %v4100_v3  ;;  %1826 = vmatprep.mubr.bf16.mxu0 %v4100_v3 }
  0x83   :  { %v4649_v39 = vpop.permute.xlu1 %170 }
  0x85   :  { %3891 = vmatmul.mubr.msk.bf16.vlgmr.msra.gmra.mxu1 %vm833_vm0, %v4192_v23  ;;  %3901 = vmatmul.mubr.msk.bf16.vlgmr.msra.gmra.mxu0 %vm833_vm0, %v4192_v23 }
  0x86   :  { %1648 = vmatpush1.bf16.msra.mxu1 %v3831_v28  ;;  %1571 = vmatprep.mubr.bf16.mxu1 %v4100_v3  ;;  %v3858_v28 = vcombine.high %v123_v24, %v155_v25 }
  0x87   :  { %1836 = vmatprep.mubr.bf16.mxu0 %v4100_v3  ;;  %1913 = vmatpush1.bf16.msra.mxu0 %v3841_v31  ;;  %v3847_v31 = vcombine.low %v118_v19, %v150_v20 }
  0x88   :  { %1649 = vmatprep.subr.bf16.mxu1 %v3768_v32  ;;  %1914 = vmatprep.subr.bf16.mxu0 %v3778_v35  ;;  %v59_v32 = vld [vmem:[%s5736_s0 + $0xe0] sm:$0xff]  ;;  %v3784_v35 = vcombine.high %v54_v29, %v86_v30 }
  0x8a   :  { %1650 = vmatpush1.bf16.msra.mxu1 %v3767_v37  ;;  %v120_v37 = vld [vmem:[%s5736_s0 + $0x2c8] sm:$0xff] }
  0x8b   :  { %1753 = vmatprep.subr.bf16.mxu1 %v3836_v40  ;;  %1915 = vmatpush1.bf16.msra.mxu0 %v3777_v41  ;;  %v3794_v40 = vcombine.high %v59_v32, %v91_v33  ;;  %v3783_v41 = vcombine.low %v54_v29, %v86_v30  ;;  %v3852_v44 = vcombine.high %v120_v37, %v152_v38 }
  0x8c   :  { %2018 = vmatprep.subr.bf16.mxu0 %v3846_v42  ;;  %v125_v42 = vld [vmem:[%s5736_s0 + $0x2f0] sm:$0xff]  ;;  %v4661_v47 = vpop.permute.xlu1 %165  ;;  %v3851_v62 = vcombine.low %v120_v37, %v152_v38 }
  0x8d   :  { %3892 = vmatmul.mubr.msk.bf16.gmra.mxu1 %vm833_vm0, %v4222_v36  ;;  %3902 = vmatmul.mubr.msk.bf16.gmra.mxu0 %vm833_vm0, %v4222_v36  ;;  %v3862_v46 = vcombine.high %v125_v42, %v157_v43  ;;  %v3861_v7 = vcombine.low %v125_v42, %v157_v43 }
  0x8e   :  { %1667 = vmatprep.mubr.bf16.mxu1 %v4100_v3  ;;  %1932 = vmatprep.mubr.bf16.mxu0 %v4100_v3 }
  0x95   :  { %3895 = vmatmul.mubr.msk.bf16.vlgmr.msra.gmra.mxu1 %vm833_vm0, %v4192_v23  ;;  %3905 = vmatmul.mubr.msk.bf16.vlgmr.msra.gmra.mxu0 %vm833_vm0, %v4192_v23 }
  0x96   :  { %1754 = vmatpush1.bf16.msra.mxu1 %v3835_v45  ;;  %1677 = vmatprep.mubr.bf16.mxu1 %v4100_v3  ;;  %v3793_v45 = vcombine.low %v59_v32, %v91_v33 }
  0x97   :  { %1942 = vmatprep.mubr.bf16.mxu0 %v4100_v3  ;;  %2019 = vmatpush1.bf16.msra.mxu0 %v3845_v48 }
  0x98   :  { %1755 = vmatprep.subr.bf16.mxu1 %v3772_v49  ;;  %2020 = vmatprep.subr.bf16.mxu0 %v3782_v52  ;;  %v4665_v49 = vpop.permute.xlu0 %180 }
  0x9a   :  { %1756 = vmatpush1.bf16.msra.mxu1 %v3771_v53 }
  0x9b   :  { %1859 = vmatprep.subr.bf16.mxu1 %v3840_v56  ;;  %2021 = vmatpush1.bf16.msra.mxu0 %v3781_v57  ;;  %v56_v56 = vld [vmem:[%s5736_s0 + $0xc8] sm:$0xff] }
  0x9c   :  { %2124 = vmatprep.subr.bf16.mxu0 %v3850_v58  ;;  %v88_v57 = vld [vmem:[%s5736_s0 + $0x1c8] sm:$0xff]  ;;  %v4690_v2 = vpop.permute.xlu0 %175 }
  0x9d   :  { %3896 = vmatmul.mubr.msk.bf16.gmra.mxu1 %vm833_vm0, %v4222_v36  ;;  %3906 = vmatmul.mubr.msk.bf16.gmra.mxu0 %vm833_vm0, %v4222_v36  ;;  %v3788_v8 = vcombine.high %v56_v56, %v88_v57 }
  0x9e   :  { %1773 = vmatprep.mubr.bf16.mxu1 %v4100_v3  ;;  %2038 = vmatprep.mubr.bf16.mxu0 %v4100_v3 }
  0xa5   :  { %3899 = vmatmul.mubr.msk.bf16.vlgmr.msra.gmra.mxu1 %vm833_vm0, %v4192_v23  ;;  %3909 = vmatmul.mubr.msk.bf16.vlgmr.msra.gmra.mxu0 %vm833_vm0, %v4192_v23 }
  0xa6   :  { %1860 = vmatpush1.bf16.msra.mxu1 %v3839_v61  ;;  %1783 = vmatprep.mubr.bf16.mxu1 %v4100_v3 }
  0xa7   :  { %2048 = vmatprep.mubr.bf16.mxu0 %v4100_v3  ;;  %2125 = vmatpush1.bf16.msra.mxu0 %v3849_v0  ;;  %v93_v0 = vld [vmem:[%s5736_s0 + $0x1f0] sm:$0xff] }
  0xa8   :  { %1861 = vmatprep.subr.bf16.mxu1 %v3776_v1  ;;  %2126 = vmatprep.subr.bf16.mxu0 %v3786_v5  ;;  %v3798_v12 = vcombine.high %v61_v63, %v93_v0  ;;  %v3797_v24 = vcombine.low %v61_v63, %v93_v0 }
  0xaa   :  { %1862 = vmatpush1.bf16.msra.mxu1 %v3775_v6 }
  0xab   :  { %1965 = vmatprep.subr.bf16.mxu1 %v3844_v9  ;;  %2127 = vmatpush1.bf16.msra.mxu0 %v3785_v10  ;;  %v4698_v9 = vld [vmem:[%s5736_s0 + $0x2d8] sm:$0xff] }
  0xac   :  { %2230 = vmatprep.subr.bf16.mxu0 %v3854_v11  ;;  %v4703_v10 = vld [vmem:[%s5736_s0 + $0x3d8] sm:$0xff] }
  0xad   :  { %3900 = vmatmul.mubr.msk.bf16.gmra.mxu1 %vm833_vm0, %v4222_v36  ;;  %3910 = vmatmul.mubr.msk.bf16.gmra.mxu0 %vm833_vm0, %v4222_v36  ;;  %v3856_v19 = vcombine.high %v4698_v9, %v4703_v10 }
  0xae   :  { %1879 = vmatprep.mubr.bf16.mxu1 %v4100_v3  ;;  %2144 = vmatprep.mubr.bf16.mxu0 %v4100_v3 }
  0xb5   :  { %3903 = vmatmul.mubr.msk.bf16.vlgmr.msra.gmra.mxu1 %vm833_vm0, %v4192_v23  ;;  %3913 = vmatmul.mubr.msk.bf16.vlgmr.msra.gmra.mxu0 %vm833_vm0, %v4192_v23 }
  0xb6   :  { %1966 = vmatpush1.bf16.msra.mxu1 %v3843_v14  ;;  %1889 = vmatprep.mubr.bf16.mxu1 %v4100_v3 }
  0xb7   :  { %2154 = vmatprep.mubr.bf16.mxu0 %v4100_v3  ;;  %2231 = vmatpush1.bf16.msra.mxu0 %v3853_v17  ;;  %v3787_v17 = vcombine.low %v56_v56, %v88_v57 }
  0xb8   :  { %1967 = vmatprep.subr.bf16.mxu1 %v3780_v18  ;;  %2232 = vmatprep.subr.bf16.mxu0 %v3790_v21 }
  0xba   :  { %1968 = vmatpush1.bf16.msra.mxu1 %v3779_v22 }
  0xbb   :  { %2071 = vmatprep.subr.bf16.mxu1 %v3848_v26  ;;  %2233 = vmatpush1.bf16.msra.mxu0 %v3789_v27 }
  0xbc   :  { %2336 = vmatprep.subr.bf16.mxu0 %v3858_v28 }
  0xbd   :  { %3904 = vmatmul.mubr.msk.bf16.gmra.mxu1 %vm833_vm0, %v4222_v36  ;;  %3914 = vmatmul.mubr.msk.bf16.gmra.mxu0 %vm833_vm0, %v4222_v36 }
  0xbe   :  { %1985 = vmatprep.mubr.bf16.mxu1 %v4100_v3  ;;  %2250 = vmatprep.mubr.bf16.mxu0 %v4100_v3 }
  0xc5   :  { %3907 = vmatmul.mubr.msk.bf16.vlgmr.msra.gmra.mxu1 %vm833_vm0, %v4192_v23  ;;  %3917 = vmatmul.mubr.msk.bf16.vlgmr.msra.gmra.mxu0 %vm833_vm0, %v4192_v23 }
  0xc6   :  { %2072 = vmatpush1.bf16.msra.mxu1 %v3847_v31  ;;  %1995 = vmatprep.mubr.bf16.mxu1 %v4100_v3 }
  0xc7   :  { %2260 = vmatprep.mubr.bf16.mxu0 %v4100_v3  ;;  %2337 = vmatpush1.bf16.msra.mxu0 %v3857_v34 }
  0xc8   :  { %2073 = vmatprep.subr.bf16.mxu1 %v3784_v35  ;;  %2338 = vmatprep.subr.bf16.mxu0 %v3794_v40 }
  0xca   :  { %2074 = vmatpush1.bf16.msra.mxu1 %v3783_v41 }
  0xcb   :  { %2177 = vmatprep.subr.bf16.mxu1 %v3852_v44  ;;  %2339 = vmatpush1.bf16.msra.mxu0 %v3793_v45 }
  0xcc   :  { %2442 = vmatprep.subr.bf16.mxu0 %v3862_v46 }
  0xcd   :  { %v874_v48 = vpop.f32.mrf.mxu1  ;;  %3908 = vmatmul.mubr.msk.bf16.gmra.mxu1 %vm833_vm0, %v4222_v36  ;;  %v980_v51 = vpop.f32.mrf.mxu0  ;;  %3918 = vmatmul.mubr.msk.bf16.gmra.mxu0 %vm833_vm0, %v4222_v36 }
  0xce   :  { %v875_v50 = vadd.f32 %v874_v48, %v4661_v47  ;;  %2091 = vmatprep.mubr.bf16.mxu1 %v4100_v3  ;;  %2356 = vmatprep.mubr.bf16.mxu0 %v4100_v3  ;;  %v981_v34 = vadd.f32 %v980_v51, %v4661_v47  ;;  %v58_v48 = vld [vmem:[%s5736_s0 + $0xd8] sm:$0xff] }
  0xcf   :  { %v876_v52 = vpop.f32.mrf.mxu1  ;;  %v4673_v54 = vpop.f32.mrf.mxu0 }
  0xd0   :  { %v877_v53 = vadd.f32 %v876_v52, %v4661_v47  ;;  %v2536_v58 = vmax.f32 %v875_v50, 0.0  ;;  %v983_v42 = vadd.f32 %v4673_v54, %v4661_v47  ;;  %v3855_v52 = vcombine.low %v4698_v9, %v4703_v10 }
  0xd1   :  { %v878_v55 = vpop.f32.mrf.mxu1  ;;  %v4682_v61 = vpop.f32.mrf.mxu0 }
  0xd2   :  { %v2537_v59 = vmax.f32 %v877_v53, 0.0  ;;  %v879_v60 = vadd.f32 %v878_v55, %v4649_v39  ;;  %v985_v50 = vadd.f32 %v4682_v61, %v4649_v39  ;;  %v2540_v53 = vmax.f32 %v981_v34, 0.0 }
  0xd3   :  { %v880_v1 = vpop.f32.mrf.mxu1  ;;  %v4693_v6 = vpop.f32.mrf.mxu0 }
  0xd4   :  { %v2794_v4 = vadd.f32 %v2537_v59, %v2536_v58  ;;  %v881_v5 = vadd.f32 %v880_v1, %v4649_v39  ;;  %v2600_v13 = vmax.f32 %v879_v60, 0.0  ;;  %v987_v58 = vadd.f32 %v4693_v6, %v4649_v39 }
  0xd5   :  { %v884_v11 = vpop.f32.mrf.mxu1  ;;  %3911 = vmatmul.mubr.msk.bf16.vlgmr.msra.gmra.mxu1 %vm833_vm0, %v4192_v23  ;;  %v4708_v16 = vpop.f32.mrf.mxu0  ;;  %3921 = vmatmul.mubr.msk.bf16.vlgmr.msra.gmra.mxu0 %vm833_vm0, %v4192_v23  ;;  %v2604_v6 = vmax.f32 %v985_v50, 0.0 }
  0xd6   :  { %v2601_v14 = vmax.f32 %v881_v5, 0.0  ;;  %v885_v15 = vadd.f32 %v884_v11, %v4690_v2  ;;  %2178 = vmatpush1.bf16.msra.mxu1 %v3851_v62  ;;  %2101 = vmatprep.mubr.bf16.mxu1 %v4100_v3  ;;  %v2541_v62 = vmax.f32 %v983_v42, 0.0  ;;  %v4770_v5 = vld [vmem:[%s5736_s0 + $0x3e8] sm:$0xff] }
  0xd7   :  { %v886_v18 = vpop.f32.mrf.mxu1  ;;  %2366 = vmatprep.mubr.bf16.mxu0 %v4100_v3  ;;  %v4717_v22 = vpop.f32.mrf.mxu0  ;;  %2443 = vmatpush1.bf16.msra.mxu0 %v3861_v7 }
  0xd8   :  { %v2827_v20 = vadd.f32 %v2601_v14, %v2600_v13  ;;  %v887_v21 = vadd.f32 %v886_v18, %v4690_v2  ;;  %2179 = vmatprep.subr.bf16.mxu1 %v3788_v8  ;;  %2444 = vmatprep.subr.bf16.mxu0 %v3798_v12  ;;  %v2664_v23 = vmax.f32 %v885_v15, 0.0  ;;  %v4775_v8 = vld [vmem:[%s5737_s1] sm:$0xff]   ;;  %v2605_v15 = vmax.f32 %v987_v58, 0.0 }
  0xd9   :  { %v888_v25 = vpop.f32.mrf.mxu1  ;;  %v4720_v28 = vpop.f32.mrf.mxu0 }
  0xda   :  { %v2665_v26 = vmax.f32 %v887_v21, 0.0  ;;  %v889_v27 = vadd.f32 %v888_v25, %v4665_v49  ;;  %2180 = vmatpush1.bf16.msra.mxu1 %v3787_v17 }
  0xdb   :  { %v890_v29 = vpop.f32.mrf.mxu1  ;;  %2283 = vmatprep.subr.bf16.mxu1 %v3856_v19  ;;  %v4725_v32 = vpop.f32.mrf.mxu0  ;;  %2445 = vmatpush1.bf16.msra.mxu0 %v3797_v24 }
  0xdc   :  { %v4722_v30 = vadd.f32 %v2665_v26, %v2664_v23  ;;  %v891_v31 = vadd.f32 %v890_v29, %v4665_v49  ;;  %v2728_v35 = vmax.f32 %v889_v27, 0.0 }
  0xdd   :  { %v927_v33 = vpop.f32.mrf.mxu1  ;;  %3912 = vmatmul.mubr.msk.bf16.gmra.mxu1 %vm833_vm0, %v4222_v36  ;;  %v4731_v40 = vpop.f32.mrf.mxu0  ;;  %3922 = vmatmul.mubr.msk.bf16.gmra.mxu0 %vm833_vm0, %v4222_v36  ;;  %v90_v36 = vld [vmem:[%s5736_s0 + $0x1d8] sm:$0xff] }
  0xde   :  { %v2729_v37 = vmax.f32 %v891_v31, 0.0  ;;  %v928_v38 = vadd.f32 %v927_v33, %v4661_v47  ;;  %2197 = vmatprep.mubr.bf16.mxu1 %v4100_v3  ;;  %2462 = vmatprep.mubr.bf16.mxu0 %v4100_v3  ;;  %v3792_v60 = vcombine.high %v58_v48, %v90_v36  ;;  %v3791_v9 = vcombine.low %v58_v48, %v90_v36 }
  0xdf   :  { %v929_v41 = vpop.f32.mrf.mxu1  ;;  %v4742_v46 = vpop.f32.mrf.mxu0 }
  0xe0   :  { %v4739_v43 = vadd.f32 %v2729_v37, %v2728_v35  ;;  %v2538_v44 = vmax.f32 %v928_v38, 0.0  ;;  %v930_v45 = vadd.f32 %v929_v41, %v4661_v47 }
  0xe1   :  { %v931_v51 = vpop.f32.mrf.mxu1  ;;  %v4755_v57 = vpop.f32.mrf.mxu0 }
  0xe2   :  { %v2795_v54 = vadd.f32 %v2794_v4, %v2538_v44  ;;  %v2539_v55 = vmax.f32 %v930_v45, 0.0  ;;  %v932_v56 = vadd.f32 %v931_v51, %v4649_v39  ;;  %v4765_v4 = vld [vmem:[%s5736_s0 + $0x2e8] sm:$0xff] }
  0xe3   :  { %v933_v59 = vpop.f32.mrf.mxu1  ;;  %v4760_v1 = vpop.f32.mrf.mxu0  ;;  %v3860_v18 = vcombine.high %v4765_v4, %v4770_v5 }
  0xe4   :  { %v2796_v63 = vadd.f32 %v2795_v54, %v2539_v55  ;;  %v2602_v0 = vmax.f32 %v932_v56, 0.0  ;;  %v934_v61 = vadd.f32 %v933_v59, %v4649_v39  ;;  %v3859_v56 = vcombine.low %v4765_v4, %v4770_v5 }
  0xe5   :  { %v937_v7 = vpop.f32.mrf.mxu1  ;;  %3915 = vmatmul.mubr.msk.bf16.vlgmr.msra.gmra.mxu1 %vm833_vm0, %v4775_v8  ;;  %v4780_v14 = vpop.f32.mrf.mxu0  ;;  %3925 = vmatmul.mubr.msk.bf16.vlgmr.msra.gmra.mxu0 %vm833_vm0, %v4775_v8 }
  0xe6   :  { %v2797_v10 = vadd.f32 %v2796_v63, %v2540_v53  ;;  %v2828_v11 = vadd.f32 %v2827_v20, %v2602_v0  ;;  %v2603_v12 = vmax.f32 %v934_v61, 0.0  ;;  %v938_v13 = vadd.f32 %v937_v7, %v4690_v2  ;;  %2284 = vmatpush1.bf16.msra.mxu1 %v3855_v52  ;;  %2207 = vmatprep.mubr.bf16.mxu1 %v4100_v3  ;;  %v60_v53 = vld [vmem:[%s5736_s0 + $0xe8] sm:$0xff]  ;;  %v4839_v63 = vld [vmem:[%s5736_s0 + $0x3f8] sm:$0xff] }
  0xe7   :  { %v939_v17 = vpop.f32.mrf.mxu1  ;;  %2472 = vmatprep.mubr.bf16.mxu0 %v4100_v3  ;;  %v4789_v24 = vpop.f32.mrf.mxu0  ;;  %2285 = vmatprep.subr.bf16.mxu1 %v3792_v60  ;;  %v1087_v0 = vadd.f32 %v4708_v16, %v4661_v47 }
  0xe8   :  { %v2829_v19 = vadd.f32 %v2828_v11, %v2603_v12  ;;  %v2666_v20 = vmax.f32 %v938_v13, 0.0  ;;  %v940_v21 = vadd.f32 %v939_v17, %v4690_v2  ;;  %v2798_v25 = vadd.f32 %v2797_v10, %v2541_v62  ;;  %v4834_v62 = vld [vmem:[%s5736_s0 + $0x2f8] sm:$0xff] }
  0xe9   :  { %v941_v23 = vpop.f32.mrf.mxu1  ;;  %v4793_v33 = vpop.f32.mrf.mxu0  ;;  %v2544_v12 = vmax.f32 %v1087_v0, 0.0 }
  0xea   :  { %v2830_v26 = vadd.f32 %v2829_v19, %v2604_v6  ;;  %v2861_v27 = vadd.f32 %v4722_v30, %v2666_v20  ;;  %v2667_v29 = vmax.f32 %v940_v21, 0.0  ;;  %v942_v31 = vadd.f32 %v941_v23, %v4665_v49  ;;  %2286 = vmatpush1.bf16.msra.mxu1 %v3791_v9  ;;  %v4803_v30 = vld [vmem:[%s5737_s1 + $0x8] sm:$0xff]  }
  0xeb   :  { %v943_v34 = vpop.f32.mrf.mxu1  ;;  %2389 = vmatprep.subr.bf16.mxu1 %v3860_v18  ;;  %v4798_v41 = vpop.f32.mrf.mxu0  ;;  %v3864_v9 = vcombine.high %v4834_v62, %v4839_v63 }
  0xec   :  { %v4795_v35 = vadd.f32 %v2861_v27, %v2667_v29  ;;  %v2730_v37 = vmax.f32 %v942_v31, 0.0  ;;  %v944_v38 = vadd.f32 %v943_v34, %v4665_v49  ;;  %v2831_v42 = vadd.f32 %v2830_v26, %v2605_v15 }
  0xed   :  { %v990_v44 = vpop.f32.mrf.mxu1  ;;  %3916 = vmatmul.mubr.msk.bf16.gmra.mxu1 %vm833_vm0, %v4803_v30  ;;  %v4808_v36 = vpop.f32.mrf.mxu0  ;;  %3926 = vmatmul.mubr.msk.bf16.gmra.mxu0 %vm833_vm0, %v4803_v30  ;;  %v1091_v15 = vadd.f32 %v4720_v28, %v4649_v39 }
  0xee   :  { %v2894_v45 = vadd.f32 %v4739_v43, %v2730_v37  ;;  %v2731_v48 = vmax.f32 %v944_v38, 0.0  ;;  %2303 = vmatprep.mubr.bf16.mxu1 %v4100_v3  ;;  %v92_v43 = vld [vmem:[%s5736_s0 + $0x1e8] sm:$0xff]  ;;  %v991_v31 = vadd.f32 %v990_v44, %v4690_v2  ;;  %v62_v44 = vld [vmem:[%s5736_s0 + $0xf8] sm:$0xff] }
  0xef   :  { %v992_v50 = vpop.f32.mrf.mxu1  ;;  %v4815_v52 = vpop.f32.mrf.mxu0  ;;  %v3796_v59 = vcombine.high %v60_v53, %v92_v43  ;;  %v3795_v6 = vcombine.low %v60_v53, %v92_v43  ;;  %v2608_v28 = vmax.f32 %v1091_v15, 0.0  ;;  %v1089_v53 = vadd.f32 %v4717_v22, %v4661_v47 }
  0xf0   :  { %v4813_v51 = vadd.f32 %v2894_v45, %v2731_v48  ;;  %v993_v0 = vadd.f32 %v992_v50, %v4690_v2  ;;  %v3863_v22 = vcombine.low %v4834_v62, %v4839_v63  ;;  %v1193_v50 = vadd.f32 %v4780_v14, %v4661_v47 }
  0xf1   :  { %v994_v54 = vpop.f32.mrf.mxu1  ;;  %v4823_v55 = vpop.f32.mrf.mxu0 }
  0xf3   :  { %v4827_v58 = vpop.f32.mrf.mxu1  ;;  %v4829_v60 = vpop.f32.mrf.mxu0 }
  0xf5   :  { %v1033_v61 = vpop.f32.mrf.mxu1  ;;  %3919 = vmatmul.mubr.msk.bf16.vlgmr.msra.gmra.mxu1 %vm833_vm0, %v4775_v8  ;;  %v4846_v5 = vpop.f32.mrf.mxu0 }
  0xf6   :  { %v1034_v4 = vadd.f32 %v1033_v61, %v4661_v47  ;;  %2390 = vmatpush1.bf16.msra.mxu1 %v3859_v56  ;;  %2313 = vmatprep.mubr.bf16.mxu1 %v4100_v3 }
  0xf7   :  { %v1035_v7 = vpop.f32.mrf.mxu1  ;;  %2391 = vmatprep.subr.bf16.mxu1 %v3796_v59  ;;  %v4852_v11 = vpop.f32.mrf.mxu0  ;;  %v2668_v59 = vmax.f32 %v991_v31, 0.0 }
  0xf8   :  { %v2542_v10 = vmax.f32 %v1034_v4, 0.0  ;;  %v1036_v16 = vadd.f32 %v1035_v7, %v4661_v47  ;;  %v995_v7 = vadd.f32 %v994_v54, %v4665_v49 }
  0xf9   :  { %v1037_v13 = vpop.f32.mrf.mxu1  ;;  %v4857_v20 = vpop.f32.mrf.mxu0 }
  0xfa   :  { %v2799_v17 = vadd.f32 %v2798_v25, %v2542_v10  ;;  %v2543_v18 = vmax.f32 %v1036_v16, 0.0  ;;  %v1038_v19 = vadd.f32 %v1037_v13, %v4649_v39  ;;  %2392 = vmatpush1.bf16.msra.mxu1 %v3795_v6  ;;  %v1093_v13 = vadd.f32 %v4725_v32, %v4649_v39 }
  0xfb   :  { %v1039_v21 = vpop.f32.mrf.mxu1  ;;  %2495 = vmatprep.subr.bf16.mxu1 %v3864_v9  ;;  %v4860_v29 = vpop.f32.mrf.mxu0  ;;  %v2732_v63 = vmax.f32 %v995_v7, 0.0 }
  0xfc   :  { %v2800_v23 = vadd.f32 %v2799_v17, %v2543_v18  ;;  %v2606_v26 = vmax.f32 %v1038_v19, 0.0  ;;  %v1040_v27 = vadd.f32 %v1039_v21, %v4649_v39  ;;  %v2863_v17 = vadd.f32 %v4795_v35, %v2668_v59 }
  0xfd   :  { %v1043_v34 = vpop.f32.mrf.mxu1  ;;  %3920 = vmatmul.mubr.msk.bf16.gmra.mxu1 %vm833_vm0, %v4803_v30  ;;  %v4865_v45 = vpop.f32.mrf.mxu0  ;;  %v2669_v18 = vmax.f32 %v993_v0, 0.0  ;;  %v997_v21 = vadd.f32 %v4827_v58, %v4665_v49  ;;  %v2896_v0 = vadd.f32 %v4813_v51, %v2732_v63 }
  0xfe   :  { %v2801_v25 = vadd.f32 %v2800_v23, %v2544_v12  ;;  %v2832_v37 = vadd.f32 %v2831_v42, %v2606_v26  ;;  %v2607_v38 = vmax.f32 %v1040_v27, 0.0  ;;  %2409 = vmatprep.mubr.bf16.mxu1 %v4100_v3  ;;  %v94_v42 = vld [vmem:[%s5736_s0 + $0x1f8] sm:$0xff]  ;;  %v1044_v9 = vadd.f32 %v1043_v34, %v4690_v2 }
  0xff   :  { %v1045_v48 = vpop.f32.mrf.mxu1  ;;  %v4870_v56 = vpop.f32.mrf.mxu0  ;;  %v3800_v16 = vcombine.high %v62_v44, %v94_v42  ;;  %v2545_v12 = vmax.f32 %v1089_v53, 0.0  ;;  %v3799_v32 = vcombine.low %v62_v44, %v94_v42  ;;  %v2609_v26 = vmax.f32 %v1093_v13, 0.0 }
 0x100   :  { %v2833_v43 = vadd.f32 %v2832_v37, %v2607_v38  ;;  %v2670_v14 = vmax.f32 %v1044_v9, 0.0  ;;  %v1046_v35 = vadd.f32 %v1045_v48, %v4690_v2  ;;  %v1097_v37 = vadd.f32 %v4731_v40, %v4690_v2 }
 0x101   :  { %v1047_v61 = vpop.f32.mrf.mxu1  ;;  %v4879_v6 = vpop.f32.mrf.mxu0  ;;  %v2802_v31 = vadd.f32 %v2801_v25, %v2545_v12  ;;  %v2548_v38 = vmax.f32 %v1193_v50, 0.0  ;;  %v2864_v53 = vadd.f32 %v2863_v17, %v2669_v18  ;;  %v1197_v48 = vadd.f32 %v4793_v33, %v4649_v39 }
 0x102   :  { %v2834_v4 = vadd.f32 %v2833_v43, %v2608_v28  ;;  %v1048_v43 = vadd.f32 %v1047_v61, %v4665_v49  ;;  %v2671_v40 = vmax.f32 %v1046_v35, 0.0 }
 0x103   :  { %v1049_v10 = vpop.f32.mrf.mxu1  ;;  %v4887_v15 = vpop.f32.mrf.mxu0  ;;  %v2865_v7 = vadd.f32 %v2864_v53, %v2670_v14 }
 0x104   :  { %v2835_v61 = vadd.f32 %v2834_v4, %v2609_v26  ;;  %v2734_v33 = vmax.f32 %v1048_v43, 0.0  ;;  %v1050_v17 = vadd.f32 %v1049_v10, %v4665_v49  ;;  %v2672_v4 = vmax.f32 %v1097_v37, 0.0 }
 0x105   :  { %v1139_v19 = vpop.f32.mrf.mxu1  ;;  %3923 = vmatmul.mubr.msk.bf16.vlgmr.msra.gmra.mxu1 %vm833_vm0, %v4775_v8  ;;  %v4895_v62 = vpop.f32.mrf.mxu0  ;;  %v2866_v35 = vadd.f32 %v2865_v7, %v2671_v40  ;;  %v1101_v10 = vadd.f32 %v4755_v57, %v4665_v49  ;;  %v1195_v26 = vadd.f32 %v4789_v24, %v4661_v47  ;;  %v1199_v24 = vadd.f32 %v4798_v41, %v4649_v39 }
 0x106   :  { %v1140_v54 = vadd.f32 %v1139_v19, %v4661_v47  ;;  %2496 = vmatpush1.bf16.msra.mxu1 %v3863_v22  ;;  %2419 = vmatprep.mubr.bf16.mxu1 %v4100_v3  ;;  %v2733_v22 = vmax.f32 %v997_v21, 0.0  ;;  %v2612_v19 = vmax.f32 %v1197_v48, 0.0  ;;  %v1099_v21 = vadd.f32 %v4742_v46, %v4690_v2 }
 0x107   :  { %v1141_v23 = vpop.f32.mrf.mxu1  ;;  %2497 = vmatprep.subr.bf16.mxu1 %v3800_v16  ;;  %v4902_v28 = vpop.f32.mrf.mxu0  ;;  %v1103_v48 = vadd.f32 %v4760_v1, %v4665_v49 }
 0x108   :  { %v2546_v27 = vmax.f32 %v1140_v54, 0.0  ;;  %v1142_v34 = vadd.f32 %v1141_v23, %v4661_v47  ;;  %v2897_v14 = vadd.f32 %v2896_v0, %v2733_v22  ;;  %v2673_v46 = vmax.f32 %v1099_v21, 0.0 }
 0x109   :  { %v1143_v58 = vpop.f32.mrf.mxu1  ;;  %v4910_v25 = vpop.f32.mrf.mxu0  ;;  %v1299_v22 = vadd.f32 %v4846_v5, %v4661_v47  ;;  %v2737_v41 = vmax.f32 %v1103_v48, 0.0 }
 0x10a   :  { %v2803_v44 = vadd.f32 %v2802_v31, %v2546_v27  ;;  %v2547_v42 = vmax.f32 %v1142_v34, 0.0  ;;  %v1144_v59 = vadd.f32 %v1143_v58, %v4649_v39  ;;  %2498 = vmatpush1.bf16.msra.mxu1 %v3799_v32  ;;  %v2898_v34 = vadd.f32 %v2897_v14, %v2734_v33 }
 0x10b   :  { %v1145_v9 = vpop.f32.mrf.mxu1  ;;  %v4914_v50 = vpop.f32.mrf.mxu0 }
 0x10c   :  { %v2804_v16 = vadd.f32 %v2803_v44, %v2547_v42  ;;  %v2610_v12 = vmax.f32 %v1144_v59, 0.0  ;;  %v1146_v13 = vadd.f32 %v1145_v9, %v4649_v39  ;;  %v2867_v44 = vadd.f32 %v2866_v35, %v2672_v4 }
 0x10d   :  { %v1149_v18 = vpop.f32.mrf.mxu1  ;;  %3924 = vmatmul.mubr.msk.bf16.gmra.mxu1 %vm833_vm0, %v4803_v30  ;;  %v4919_v63 = vpop.f32.mrf.mxu0  ;;  %v2736_v42 = vmax.f32 %v1101_v10, 0.0  ;;  %v2549_v59 = vmax.f32 %v1195_v26, 0.0  ;;  %v1303_v35 = vadd.f32 %v4857_v20, %v4649_v39  ;;  %v1205_v20 = vadd.f32 %v4815_v52, %v4690_v2 }
 0x10e   :  { %v2805_v51 = vadd.f32 %v2804_v16, %v2548_v38  ;;  %v2836_v54 = vadd.f32 %v2835_v61, %v2610_v12  ;;  %v2611_v32 = vmax.f32 %v1146_v13, 0.0  ;;  %2515 = vmatprep.mubr.bf16.mxu1 %v4100_v3  ;;  %v2735_v38 = vmax.f32 %v1050_v17, 0.0 }
 0x10f   :  { %v1151_v23 = vpop.f32.mrf.mxu1  ;;  %v4928_v31 = vpop.f32.mrf.mxu0  ;;  %v1150_v53 = vadd.f32 %v1149_v18, %v4690_v2  ;;  %v1203_v61 = vadd.f32 %v4808_v36, %v4690_v2  ;;  %v2868_v13 = vadd.f32 %v2867_v44, %v2673_v46  ;;  %v2613_v17 = vmax.f32 %v1199_v24, 0.0 }
 0x110   :  { %v2837_v27 = vadd.f32 %v2836_v54, %v2611_v32  ;;  %v2899_v7 = vadd.f32 %v2898_v34, %v2735_v38  ;;  %v1152_v9 = vadd.f32 %v1151_v23, %v4690_v2  ;;  %v2552_v32 = vmax.f32 %v1299_v22, 0.0 }
 0x111   :  { %v1153_v37 = vpop.f32.mrf.mxu1  ;;  %v4931_v58 = vpop.f32.mrf.mxu0  ;;  %v2674_v40 = vmax.f32 %v1150_v53, 0.0 }
 0x112   :  { %v2838_v43 = vadd.f32 %v2837_v27, %v2612_v19  ;;  %v1154_v5 = vadd.f32 %v1153_v37, %v4665_v49  ;;  %v2806_v19 = vadd.f32 %v2805_v51, %v2549_v59  ;;  %v2900_v4 = vadd.f32 %v2899_v7, %v2736_v42 }
 0x113   :  { %v1155_v57 = vpop.f32.mrf.mxu1  ;;  %v4937_v0 = vpop.f32.mrf.mxu0  ;;  %v2869_v21 = vadd.f32 %v2868_v13, %v2674_v40  ;;  %v2675_v14 = vmax.f32 %v1152_v9, 0.0  ;;  %v2676_v27 = vmax.f32 %v1203_v61, 0.0  ;;  %v1207_v42 = vadd.f32 %v4823_v55, %v4665_v49 }
 0x114   :  { %v2738_v51 = vmax.f32 %v1154_v5, 0.0  ;;  %v1156_v34 = vadd.f32 %v1155_v57, %v4665_v49  ;;  %v2839_v46 = vadd.f32 %v2838_v43, %v2613_v17  ;;  %v2901_v24 = vadd.f32 %v2900_v4, %v2737_v41 }
 0x115   :  { %v1245_v16 = vpop.f32.mrf.mxu1  ;;  %3927 = vmatmul.mubr.msk.bf16.vlgmr.msra.gmra.mxu1 %vm833_vm0, %v4775_v8  ;;  %v4945_v12 = vpop.f32.mrf.mxu0  ;;  %v2870_v59 = vadd.f32 %v2869_v21, %v2675_v14  ;;  %v2616_v57 = vmax.f32 %v1303_v35, 0.0  ;;  %v1301_v55 = vadd.f32 %v4852_v11, %v4661_v47  ;;  %v2677_v5 = vmax.f32 %v1205_v20, 0.0 }
 0x116   :  { %v1246_v1 = vadd.f32 %v1245_v16, %v4661_v47  ;;  %2525 = vmatprep.mubr.bf16.mxu1 %v4100_v3  ;;  %v2902_v16 = vadd.f32 %v2901_v24, %v2738_v51  ;;  %v2740_v17 = vmax.f32 %v1207_v42, 0.0  ;;  %v1305_v11 = vadd.f32 %v4860_v29, %v4649_v39 }
 0x117   :  { %v1247_v33 = vpop.f32.mrf.mxu1  ;;  %v4952_v8 = vpop.f32.mrf.mxu0 }
 0x118   :  { %v2550_v18 = vmax.f32 %v1246_v1, 0.0  ;;  %v1248_v54 = vadd.f32 %v1247_v33, %v4661_v47  ;;  %v2739_v1 = vmax.f32 %v1156_v34, 0.0  ;;  %v2871_v33 = vadd.f32 %v2870_v59, %v2676_v27 }
 0x119   :  { %v1249_v3 = vpop.f32.mrf.mxu1  ;;  %v4957_v26 = vpop.f32.mrf.mxu0 }
 0x11a   :  { %v2807_v36 = vadd.f32 %v2806_v19, %v2550_v18  ;;  %v2551_v23 = vmax.f32 %v1248_v54, 0.0  ;;  %v1250_v10 = vadd.f32 %v1249_v3, %v4649_v39  ;;  %v1209_v54 = vadd.f32 %v4829_v60, %v4665_v49 }
 0x11b   :  { %v1251_v38 = vpop.f32.mrf.mxu1  ;;  %v4961_v44 = vpop.f32.mrf.mxu0  ;;  %v2553_v3 = vmax.f32 %v1301_v55, 0.0  ;;  %v1405_v60 = vadd.f32 %v4895_v62, %v4661_v47  ;;  %v1409_v62 = vadd.f32 %v4910_v25, %v4649_v39  ;;  %v1313_v55 = vadd.f32 %v4879_v6, %v4665_v49 }
 0x11c   :  { %v2808_v53 = vadd.f32 %v2807_v36, %v2551_v23  ;;  %v2614_v37 = vmax.f32 %v1250_v10, 0.0  ;;  %v1252_v48 = vadd.f32 %v1251_v38, %v4649_v39  ;;  %v1309_v36 = vadd.f32 %v4865_v45, %v4690_v2 }
 0x11d   :  { %v1255_v22 = vpop.f32.mrf.mxu1  ;;  %3928 = vmatmul.mubr.msk.bf16.gmra.mxu1 %vm833_vm0, %v4803_v30  ;;  %v4969_v9 = vpop.f32.mrf.mxu0  ;;  %v2872_v23 = vadd.f32 %v2871_v33, %v2677_v5  ;;  %v2741_v38 = vmax.f32 %v1209_v54, 0.0 }
 0x11e   :  { %v2809_v7 = vadd.f32 %v2808_v53, %v2552_v32  ;;  %v2840_v40 = vadd.f32 %v2839_v46, %v2614_v37  ;;  %v2615_v43 = vmax.f32 %v1252_v48, 0.0  ;;  %v1256_v61 = vadd.f32 %v1255_v22, %v4690_v2 }
 0x11f   :  { %v1257_v52 = vpop.f32.mrf.mxu1  ;;  %v4974_v41 = vpop.f32.mrf.mxu0  ;;  %v2903_v32 = vadd.f32 %v2902_v16, %v2739_v1  ;;  %v2617_v48 = vmax.f32 %v1305_v11, 0.0  ;;  %v2680_v24 = vmax.f32 %v1309_v36, 0.0 }
 0x120   :  { %v2841_v13 = vadd.f32 %v2840_v40, %v2615_v43  ;;  %v2678_v4 = vmax.f32 %v1256_v61, 0.0  ;;  %v1258_v21 = vadd.f32 %v1257_v52, %v4690_v2  ;;  %v2810_v42 = vadd.f32 %v2809_v7, %v2553_v3 }
 0x121   :  { %v1259_v30 = vpop.f32.mrf.mxu1  ;;  %v4976_v19 = vpop.f32.mrf.mxu0  ;;  %v2904_v53 = vadd.f32 %v2903_v32, %v2740_v17  ;;  %v2556_v43 = vmax.f32 %v1405_v60, 0.0  ;;  %v1311_v7 = vadd.f32 %v4870_v56, %v4690_v2 }
 0x122   :  { %v2842_v18 = vadd.f32 %v2841_v13, %v2616_v57  ;;  %v1260_v10 = vadd.f32 %v1259_v30, %v4665_v49  ;;  %v2873_v37 = vadd.f32 %v2872_v23, %v2678_v4  ;;  %v2679_v29 = vmax.f32 %v1258_v21, 0.0 }
 0x123   :  { %v1261_v14 = vpop.f32.mrf.mxu1  ;;  %v4983_v35 = vpop.f32.mrf.mxu0  ;;  %v2905_v5 = vadd.f32 %v2904_v53, %v2741_v38  ;;  %v2620_v4 = vmax.f32 %v1409_v62, 0.0  ;;  %v1411_v38 = vadd.f32 %v4914_v50, %v4649_v39  ;;  %v1511_v50 = vadd.f32 %v4945_v12, %v4661_v47 }
 0x124   :  { %v2742_v22 = vmax.f32 %v1260_v10, 0.0  ;;  %v1262_v57 = vadd.f32 %v1261_v14, %v4665_v49  ;;  %v2874_v13 = vadd.f32 %v2873_v37, %v2679_v29  ;;  %v2843_v17 = vadd.f32 %v2842_v18, %v2617_v48 }
 0x125   :  { %v1351_v27 = vpop.f32.mrf.mxu1  ;;  %v4991_v34 = vpop.f32.mrf.mxu0  ;;  %v2681_v10 = vmax.f32 %v1311_v7, 0.0  ;;  %v1315_v18 = vadd.f32 %v4887_v15, %v4665_v49  ;;  %v5026_v48 = vadd.f32 %v4928_v31, %v4690_v2  ;;  %v5030_v15 = vadd.f32 %v4931_v58, %v4665_v49 }
 0x126   :  { %v1352_v51 = vadd.f32 %v1351_v27, %v4661_v47  ;;  %v2906_v21 = vadd.f32 %v2905_v5, %v2742_v22  ;;  %v2743_v14 = vmax.f32 %v1262_v57, 0.0  ;;  %v2744_v27 = vmax.f32 %v1313_v55, 0.0 }
 0x127   :  { %v1353_v46 = vpop.f32.mrf.mxu1  ;;  %v4994_v59 = vpop.f32.mrf.mxu0  ;;  %v2875_v53 = vadd.f32 %v2874_v13, %v2680_v24  ;;  %v2745_v58 = vmax.f32 %v1315_v18, 0.0  ;;  %v2560_v13 = vmax.f32 %v1511_v50, 0.0 }
 0x128   :  { %v2554_v20 = vmax.f32 %v1352_v51, 0.0  ;;  %v1354_v45 = vadd.f32 %v1353_v46, %v4661_v47  ;;  %v1407_v51 = vadd.f32 %v4902_v28, %v4661_v47  ;;  %v5022_v46 = vadd.f32 %v4919_v63, %v4690_v2 }
 0x129   :  { %v1355_v40 = vpop.f32.mrf.mxu1  ;;  %v5000_v52 = vpop.f32.mrf.mxu0  ;;  %v2907_v28 = vadd.f32 %v2906_v21, %v2743_v14  ;;  %v5039_v63 = vadd.f32 %v4952_v8, %v4661_v47  ;;  %v1515_v14 = vadd.f32 %v4957_v26, %v4649_v39 }
 0x12a   :  { %v2811_v16 = vadd.f32 %v2810_v42, %v2554_v20  ;;  %v2555_v1 = vmax.f32 %v1354_v45, 0.0  ;;  %v1356_v61 = vadd.f32 %v1355_v40, %v4649_v39  ;;  %v2557_v57 = vmax.f32 %v1407_v51, 0.0 }
 0x12b   :  { %v1357_v25 = vpop.f32.mrf.mxu1  ;;  %v5007_v32 = vpop.f32.mrf.mxu0  ;;  %v2621_v40 = vmax.f32 %v1411_v38, 0.0  ;;  %v2684_v12 = vmax.f32 %v5022_v46, 0.0  ;;  %v2908_v7 = vadd.f32 %v2907_v28, %v2744_v27 }
 0x12c   :  { %v2812_v33 = vadd.f32 %v2811_v16, %v2555_v1  ;;  %v2618_v30 = vmax.f32 %v1356_v61, 0.0  ;;  %v1358_v54 = vadd.f32 %v1357_v25, %v4649_v39  ;;  %v2685_v1 = vmax.f32 %v5026_v48, 0.0 }
 0x12d   :  { %v1361_v3 = vpop.f32.mrf.mxu1  ;;  %v5010_v6 = vpop.f32.mrf.mxu0  ;;  %v2748_v61 = vmax.f32 %v5030_v15, 0.0  ;;  %v2909_v27 = vadd.f32 %v2908_v7, %v2745_v58  ;;  %v2624_v58 = vmax.f32 %v1515_v14, 0.0  ;;  %v1617_v15 = vadd.f32 %v4991_v34, %v4661_v47 }
 0x12e   :  { %v2813_v11 = vadd.f32 %v2812_v33, %v2556_v43  ;;  %v2844_v36 = vadd.f32 %v2843_v17, %v2618_v30  ;;  %v2619_v56 = vmax.f32 %v1358_v54, 0.0  ;;  %v1362_v23 = vadd.f32 %v1361_v3, %v4690_v2 }
 0x12f   :  { %v1363_v60 = vpop.f32.mrf.mxu1  ;;  %v5018_v29 = vpop.f32.mrf.mxu0  ;;  %v2876_v43 = vadd.f32 %v2875_v53, %v2681_v10  ;;  %v2561_v30 = vmax.f32 %v5039_v63, 0.0  ;;  %v1517_v10 = vadd.f32 %v4961_v44, %v4649_v39 }
 0x130   :  { %v2845_v37 = vadd.f32 %v2844_v36, %v2619_v56  ;;  %v2682_v45 = vmax.f32 %v1362_v23, 0.0  ;;  %v1364_v24 = vadd.f32 %v1363_v60, %v4690_v2  ;;  %v2814_v36 = vadd.f32 %v2813_v11, %v2557_v57 }
 0x131   :  { %v1365_v20 = vpop.f32.mrf.mxu1  ;;  %v5035_v62 = vpop.f32.mrf.mxu0  ;;  %v2625_v14 = vmax.f32 %v1517_v10, 0.0 }
 0x132   :  { %v2846_v42 = vadd.f32 %v2845_v37, %v2620_v4  ;;  %v1366_v31 = vadd.f32 %v1365_v20, %v4665_v49  ;;  %v2877_v8 = vadd.f32 %v2876_v43, %v2682_v45  ;;  %v2683_v5 = vmax.f32 %v1364_v24, 0.0 }
 0x133   :  { %v1367_v22 = vpop.f32.mrf.mxu1  ;;  %v5042_v16 = vpop.f32.mrf.mxu0 }
 0x134   :  { %v2746_v17 = vmax.f32 %v1366_v31, 0.0  ;;  %v1368_v54 = vadd.f32 %v1367_v22, %v4665_v49  ;;  %v2878_v38 = vadd.f32 %v2877_v8, %v2683_v5  ;;  %v2847_v44 = vadd.f32 %v2846_v42, %v2621_v40 }
 0x135   :  { %v1457_v55 = vpop.f32.mrf.mxu1  ;;  %v1722_v33 = vpop.f32.mrf.mxu0  ;;  %v1421_v42 = vadd.f32 %v4937_v0, %v4665_v49 }
 0x136   :  { %v1458_v25 = vadd.f32 %v1457_v55, %v4661_v47  ;;  %v1723_v4 = vadd.f32 %v1722_v33, %v4661_v47  ;;  %v2910_v26 = vadd.f32 %v2909_v27, %v2746_v17  ;;  %v2747_v20 = vmax.f32 %v1368_v54, 0.0 }
 0x137   :  { %v1459_v21 = vpop.f32.mrf.mxu1  ;;  %v1724_v23 = vpop.f32.mrf.mxu0  ;;  %v2879_v40 = vadd.f32 %v2878_v38, %v2684_v12  ;;  %v2749_v0 = vmax.f32 %v1421_v42, 0.0 }
 0x138   :  { %v2558_v3 = vmax.f32 %v1458_v25, 0.0  ;;  %v1460_v56 = vadd.f32 %v1459_v21, %v4661_v47  ;;  %v2568_v18 = vmax.f32 %v1723_v4, 0.0  ;;  %v1725_v60 = vadd.f32 %v1724_v23, %v4661_v47 }
 0x139   :  { %v1461_v51 = vpop.f32.mrf.mxu1  ;;  %v1726_v28 = vpop.f32.mrf.mxu0  ;;  %v2911_v54 = vadd.f32 %v2910_v26, %v2747_v20  ;;  %v2880_v10 = vadd.f32 %v2879_v40, %v2685_v1  ;;  %v1523_v1 = vadd.f32 %v4974_v41, %v4690_v2  ;;  %v1623_v40 = vadd.f32 %v5007_v32, %v4649_v39 }
 0x13a   :  { %v2815_v53 = vadd.f32 %v2814_v36, %v2558_v3  ;;  %v2559_v37 = vmax.f32 %v1460_v56, 0.0  ;;  %v1462_v46 = vadd.f32 %v1461_v51, %v4649_v39  ;;  %v2569_v11 = vmax.f32 %v1725_v60, 0.0 }
 0x13b   :  { %v1727_v50 = vadd.f32 %v1726_v28, %v4649_v39  ;;  %v1463_v45 = vpop.f32.mrf.mxu1  ;;  %v1728_v22 = vpop.f32.mrf.mxu0  ;;  %v2912_v12 = vadd.f32 %v2911_v54, %v2748_v61 }
 0x13c   :  { %v2816_v24 = vadd.f32 %v2815_v53, %v2559_v37  ;;  %v2622_v63 = vmax.f32 %v1462_v46, 0.0  ;;  %v1464_v31 = vadd.f32 %v1463_v45, %v4649_v39  ;;  %v5060_v57 = vadd.f32 %v2569_v11, %v2568_v18 }
 0x13d   :  { %v2632_v43 = vmax.f32 %v1727_v50, 0.0  ;;  %v1729_v7 = vadd.f32 %v1728_v22, %v4649_v39  ;;  %v1467_v55 = vpop.f32.mrf.mxu1  ;;  %v5064_v17 = vpop.f32.mrf.mxu0  ;;  %v2913_v45 = vadd.f32 %v2912_v12, %v2749_v0 }
 0x13e   :  { %v2817_v8 = vadd.f32 %v2816_v24, %v2560_v13  ;;  %v2848_v5 = vadd.f32 %v2847_v44, %v2622_v63  ;;  %v2623_v25 = vmax.f32 %v1464_v31, 0.0  ;;  %v1468_v33 = vadd.f32 %v1467_v55, %v4690_v2 }
 0x13f   :  { %v2633_v4 = vmax.f32 %v1729_v7, 0.0  ;;  %v1469_v21 = vpop.f32.mrf.mxu1  ;;  %v5068_v36 = vpop.f32.mrf.mxu0  ;;  %v1619_v44 = vadd.f32 %v4994_v59, %v4661_v47  ;;  %v2689_v59 = vmax.f32 %v1523_v1, 0.0 }
 0x140   :  { %v2849_v3 = vadd.f32 %v2848_v5, %v2623_v25  ;;  %v2818_v56 = vadd.f32 %v2817_v8, %v2561_v30  ;;  %v2686_v13 = vmax.f32 %v1468_v33, 0.0  ;;  %v1470_v27 = vadd.f32 %v1469_v21, %v4690_v2 }
 0x141   :  { %v5070_v23 = vadd.f32 %v2633_v4, %v2632_v43  ;;  %v1471_v18 = vpop.f32.mrf.mxu1  ;;  %v5074_v53 = vpop.f32.mrf.mxu0  ;;  %v1521_v30 = vadd.f32 %v4969_v9, %v4690_v2  ;;  %v1525_v9 = vadd.f32 %v4976_v19, %v4665_v49  ;;  %v2564_v8 = vmax.f32 %v1617_v15, 0.0 }
 0x142   :  { %v2850_v60 = vadd.f32 %v2849_v3, %v2624_v58  ;;  %v1472_v51 = vadd.f32 %v1471_v18, %v4665_v49  ;;  %v2881_v28 = vadd.f32 %v2880_v10, %v2686_v13  ;;  %v2687_v26 = vmax.f32 %v1470_v27, 0.0 }
 0x143   :  { %v1473_v38 = vpop.f32.mrf.mxu1  ;;  %v5082_v37 = vpop.f32.mrf.mxu0  ;;  %v2688_v63 = vmax.f32 %v1521_v30, 0.0  ;;  %v1621_v58 = vadd.f32 %v5000_v52, %v4649_v39  ;;  %v2752_v42 = vmax.f32 %v1525_v9, 0.0  ;;  %v2565_v4 = vmax.f32 %v1619_v44, 0.0 }
 0x144   :  { %v2851_v46 = vadd.f32 %v2850_v60, %v2625_v14  ;;  %v2750_v20 = vmax.f32 %v1472_v51, 0.0  ;;  %v1474_v11 = vadd.f32 %v1473_v38, %v4665_v49  ;;  %v2882_v43 = vadd.f32 %v2881_v28, %v2687_v26 }
 0x145   :  { %v1563_v50 = vpop.f32.mrf.mxu1  ;;  %v5088_v48 = vpop.f32.mrf.mxu0  ;;  %v2628_v13 = vmax.f32 %v1621_v58, 0.0  ;;  %v2629_v38 = vmax.f32 %v1623_v40, 0.0 }
 0x146   :  { %v1564_v61 = vadd.f32 %v1563_v50, %v4661_v47  ;;  %v2914_v7 = vadd.f32 %v2913_v45, %v2750_v20  ;;  %v2751_v41 = vmax.f32 %v1474_v11, 0.0  ;;  %v2883_v27 = vadd.f32 %v2882_v43, %v2688_v63 }
 0x147   :  { %v1565_v24 = vpop.f32.mrf.mxu1  ;;  %v5097_v34 = vpop.f32.mrf.mxu0 }
 0x148   :  { %v2562_v31 = vmax.f32 %v1564_v61, 0.0  ;;  %v1566_v22 = vadd.f32 %v1565_v24, %v4661_v47  ;;  %v2915_v18 = vadd.f32 %v2914_v7, %v2751_v41  ;;  %v2884_v50 = vadd.f32 %v2883_v27, %v2689_v59 }
 0x149   :  { %v1567_v55 = vpop.f32.mrf.mxu1  ;;  %v5102_v33 = vpop.f32.mrf.mxu0  ;;  %v1627_v24 = vadd.f32 %v5010_v6, %v4690_v2  ;;  %v1631_v6 = vadd.f32 %v5035_v62, %v4665_v49  ;;  %v1633_v62 = vadd.f32 %v5042_v16, %v4665_v49 }
 0x14a   :  { %v2819_v19 = vadd.f32 %v2818_v56, %v2562_v31  ;;  %v2563_v5 = vmax.f32 %v1566_v22, 0.0  ;;  %v1568_v25 = vadd.f32 %v1567_v55, %v4649_v39  ;;  %v1527_v56 = vadd.f32 %v4983_v35, %v4665_v49 }
 0x14b   :  { %v1569_v54 = vpop.f32.mrf.mxu1  ;;  %v5107_v3 = vpop.f32.mrf.mxu0  ;;  %v2916_v1 = vadd.f32 %v2915_v18, %v2752_v42 }
 0x14c   :  { %v2820_v21 = vadd.f32 %v2819_v19, %v2563_v5  ;;  %v2626_v52 = vmax.f32 %v1568_v25, 0.0  ;;  %v1570_v14 = vadd.f32 %v1569_v54, %v4649_v39  ;;  %v2753_v61 = vmax.f32 %v1527_v56, 0.0 }
 0x14d   :  { %v1573_v60 = vpop.f32.mrf.mxu1  ;;  %v5112_v10 = vpop.f32.mrf.mxu0  ;;  %v2692_v5 = vmax.f32 %v1627_v24, 0.0  ;;  %v1629_v25 = vadd.f32 %v5018_v29, %v4690_v2 }
 0x14e   :  { %v2821_v51 = vadd.f32 %v2820_v21, %v2564_v8  ;;  %v2852_v0 = vadd.f32 %v2851_v46, %v2626_v52  ;;  %v2627_v12 = vmax.f32 %v1570_v14, 0.0  ;;  %v1574_v32 = vadd.f32 %v1573_v60, %v4690_v2 }
 0x14f   :  { %v1575_v30 = vpop.f32.mrf.mxu1  ;;  %v5115_v11 = vpop.f32.mrf.mxu0  ;;  %v2917_v55 = vadd.f32 %v2916_v1, %v2753_v61  ;;  %v2693_v29 = vmax.f32 %v1629_v25, 0.0  ;;  %v2756_v60 = vmax.f32 %v1631_v6, 0.0  ;;  %v2757_v61 = vmax.f32 %v1633_v62, 0.0 }
 0x150   :  { %v2853_v28 = vadd.f32 %v2852_v0, %v2627_v12  ;;  %v2690_v26 = vmax.f32 %v1574_v32, 0.0  ;;  %v1576_v20 = vadd.f32 %v1575_v30, %v4690_v2  ;;  %v2822_v35 = vadd.f32 %v2821_v51, %v2565_v4 }
 0x151   :  { %v1577_v15 = vpop.f32.mrf.mxu1  ;;  %v5118_v45 = vpop.f32.mrf.mxu0 }
 0x152   :  { %v2854_v9 = vadd.f32 %v2853_v28, %v2628_v13  ;;  %v1578_v46 = vadd.f32 %v1577_v15, %v4665_v49  ;;  %v2885_v63 = vadd.f32 %v2884_v50, %v2690_v26  ;;  %v2691_v44 = vmax.f32 %v1576_v20, 0.0 }
 0x153   :  { %v1579_v31 = vpop.f32.mrf.mxu1  ;;  %v5123_v43 = vpop.f32.mrf.mxu0 }
 0x154   :  { %v2754_v22 = vmax.f32 %v1578_v46, 0.0  ;;  %v1580_v58 = vadd.f32 %v1579_v31, %v4665_v49  ;;  %v2855_v7 = vadd.f32 %v2854_v9, %v2629_v38  ;;  %v2886_v59 = vadd.f32 %v2885_v63, %v2691_v44 }
 0x155   :  { %v1669_v41 = vpop.f32.mrf.mxu1  ;;  %v5126_v19 = vpop.f32.mrf.mxu0 }
 0x156   :  { %v1670_v8 = vadd.f32 %v1669_v41, %v4661_v47  ;;  %v2918_v40 = vadd.f32 %v2917_v55, %v2754_v22  ;;  %v2755_v54 = vmax.f32 %v1580_v58, 0.0  ;;  %v2887_v51 = vadd.f32 %v2886_v59, %v2692_v5 }
 0x157   :  { %v1671_v42 = vpop.f32.mrf.mxu1  ;;  %v5133_v52 = vpop.f32.mrf.mxu0 }
 0x158   :  { %v2566_v4 = vmax.f32 %v1670_v8, 0.0  ;;  %v1672_v21 = vadd.f32 %v1671_v42, %v4661_v47  ;;  %v2919_v12 = vadd.f32 %v2918_v40, %v2755_v54  ;;  %v2888_v1 = vadd.f32 %v2887_v51, %v2693_v29 }
 0x159   :  { %v1673_v14 = vpop.f32.mrf.mxu1  ;;  %v5136_v18 = vpop.f32.mrf.mxu0  ;;  %v1829_v40 = vadd.f32 %v5088_v48, %v4661_v47 }
 0x15a   :  { %v2823_v56 = vadd.f32 %v2822_v35, %v2566_v4  ;;  %v2567_v13 = vmax.f32 %v1672_v21, 0.0  ;;  %v1674_v27 = vadd.f32 %v1673_v14, %v4649_v39  ;;  %v2920_v9 = vadd.f32 %v2919_v12, %v2756_v60 }
 0x15b   :  { %v1675_v0 = vpop.f32.mrf.mxu1  ;;  %v5141_v30 = vpop.f32.mrf.mxu0 }
 0x15c   :  { %v2630_v32 = vmax.f32 %v1674_v27, 0.0  ;;  %v1676_v38 = vadd.f32 %v1675_v0, %v4649_v39  ;;  %v5143_v28 = vadd.f32 %v2823_v56, %v2567_v13  ;;  %v2921_v5 = vadd.f32 %v2920_v9, %v2757_v61 }
 0x15d   :  { %v1679_v26 = vpop.f32.mrf.mxu1  ;;  %v5146_v15 = vpop.f32.mrf.mxu0  ;;  %v1831_v13 = vadd.f32 %v5097_v34, %v4661_v47  ;;  %v2572_v0 = vmax.f32 %v1829_v40, 0.0 }
 0x15e   :  { %5745 = vst [vmem:[#allocation2_spill] sm:$0xff] %v5143_v28  ;;  %v2856_v20 = vadd.f32 %v2855_v7, %v2630_v32  ;;  %v2631_v35 = vmax.f32 %v1676_v38, 0.0  ;;  %v1680_v50 = vadd.f32 %v1679_v26, %v4690_v2 }
 0x15f   :  { %v1681_v16 = vpop.f32.mrf.mxu1  ;;  %v5149_v63 = vpop.f32.mrf.mxu0 }
 0x160   :  { %v2694_v46 = vmax.f32 %v1680_v50, 0.0  ;;  %v1682_v24 = vadd.f32 %v1681_v16, %v4690_v2  ;;  %v5151_v44 = vadd.f32 %v2856_v20, %v2631_v35  ;;  %v2573_v20 = vmax.f32 %v1831_v13, 0.0 }
 0x161   :  { %v1683_v31 = vpop.f32.mrf.mxu1  ;;  %v5154_v41 = vpop.f32.mrf.mxu0 }
 0x162   :  { %v2889_v22 = vadd.f32 %v2888_v1, %v2694_v46  ;;  %v2695_v58 = vmax.f32 %v1682_v24, 0.0  ;;  %v1684_v7 = vadd.f32 %v1683_v31, %v4665_v49 }
 0x163   :  { %v1685_v55 = vpop.f32.mrf.mxu1  ;;  %v5157_v6 = vpop.f32.mrf.mxu0 }
 0x164   :  { %v2758_v8 = vmax.f32 %v1684_v7, 0.0  ;;  %v1686_v25 = vadd.f32 %v1685_v55, %v4665_v49  ;;  %v2890_v59 = vadd.f32 %v2889_v22, %v2695_v58 }
 0x165   :  { %v1775_v42 = vpop.f32.mrf.mxu1  ;;  %v5162_v14 = vpop.f32.mrf.mxu0 }
 0x166   :  { %v2922_v54 = vadd.f32 %v2921_v5, %v2758_v8  ;;  %v2759_v4 = vmax.f32 %v1686_v25, 0.0  ;;  %v1776_v21 = vadd.f32 %v1775_v42, %v4661_v47  ;;  %2891 = vadd.xlane.f32.xlu0 %v2890_v59  ;;  %v1733_v59 = vadd.f32 %v5064_v17, %v4690_v2 }
 0x167   :  { %v1777_v56 = vpop.f32.mrf.mxu1  ;;  %v5167_v60 = vpop.f32.mrf.mxu0  ;;  %v1739_v17 = vadd.f32 %v5082_v37, %v4665_v49 }
 0x168   :  { %v2570_v27 = vmax.f32 %v1776_v21, 0.0  ;;  %v1778_v29 = vadd.f32 %v1777_v56, %v4661_v47  ;;  %v2923_v62 = vadd.f32 %v2922_v54, %v2759_v4 }
 0x169   :  { %v1779_v51 = vpop.f32.mrf.mxu1  ;;  %v5171_v38 = vpop.f32.mrf.mxu0 }
 0x16a   :  { %v2932_v48 = vadd.f32 %v5060_v57, %v2570_v27  ;;  %v2571_v12 = vmax.f32 %v1778_v29, 0.0  ;;  %v1780_v32 = vadd.f32 %v1779_v51, %v4649_v39  ;;  %2924 = vadd.xlane.f32.xlu0 %v2923_v62  ;;  %v1737_v27 = vadd.f32 %v5074_v53, %v4665_v49 }
 0x16b   :  { %v1781_v26 = vpop.f32.mrf.mxu1  ;;  %v5174_v61 = vpop.f32.mrf.mxu0 }
 0x16c   :  { %v2933_v35 = vadd.f32 %v2932_v48, %v2571_v12  ;;  %v2634_v34 = vmax.f32 %v1780_v32, 0.0  ;;  %v1782_v50 = vadd.f32 %v1781_v26, %v4649_v39  ;;  %v2760_v53 = vmax.f32 %v1737_v27, 0.0 }
 0x16d   :  { %v1785_v1 = vpop.f32.mrf.mxu1  ;;  %v5177_v57 = vpop.f32.mrf.mxu0 }
 0x16e   :  { %v2934_v16 = vadd.f32 %v2933_v35, %v2572_v0  ;;  %v2965_v9 = vadd.f32 %v5070_v23, %v2634_v34  ;;  %v2635_v46 = vmax.f32 %v1782_v50, 0.0  ;;  %v1735_v23 = vadd.f32 %v5068_v36, %v4690_v2 }
 0x16f   :  { %v1787_v24 = vpop.f32.mrf.mxu1  ;;  %v5181_v22 = vpop.f32.mrf.mxu0  ;;  %v1786_v4 = vadd.f32 %v1785_v1, %v4690_v2  ;;  %v2696_v36 = vmax.f32 %v1733_v59, 0.0  ;;  %v2761_v50 = vmax.f32 %v1739_v17, 0.0 }
 0x170   :  { %v5179_v31 = vadd.f32 %v2965_v9, %v2635_v46  ;;  %v2935_v58 = vadd.f32 %v2934_v16, %v2573_v20  ;;  %v2697_v62 = vmax.f32 %v1735_v23, 0.0  ;;  %v1788_v20 = vadd.f32 %v1787_v24, %v4690_v2 }
 0x171   :  { %v1789_v7 = vpop.f32.mrf.mxu1  ;;  %v5183_v55 = vpop.f32.mrf.mxu0  ;;  %v2698_v26 = vmax.f32 %v1786_v4, 0.0  ;;  %v3030_v23 = vadd.f32 %v2761_v50, %v2760_v53 }
 0x172   :  { %v1790_v12 = vadd.f32 %v1789_v7, %v4665_v49  ;;  %v2997_v1 = vadd.f32 %v2697_v62, %v2696_v36  ;;  %v1839_v7 = vadd.f32 %v5112_v10, %v4690_v2  ;;  %v2699_v59 = vmax.f32 %v1788_v20, 0.0 }
 0x173   :  { %v1791_v8 = vpop.f32.mrf.mxu1  ;;  %v5185_v5 = vpop.f32.mrf.mxu0  ;;  %v1841_v10 = vadd.f32 %v5115_v11, %v4690_v2  ;;  %v1845_v20 = vadd.f32 %v5123_v43, %v4665_v49 }
 0x174   :  { %v2762_v9 = vmax.f32 %v1790_v12, 0.0  ;;  %v1792_v46 = vadd.f32 %v1791_v8, %v4665_v49  ;;  %v2700_v17 = vmax.f32 %v1839_v7, 0.0 }
 0x175   :  { %v1881_v25 = vpop.f32.mrf.mxu1  ;;  %v5192_v40 = vpop.f32.mrf.mxu0  ;;  %v2765_v43 = vmax.f32 %v1845_v20, 0.0 }
 0x176   :  { %v1882_v42 = vadd.f32 %v1881_v25, %v4661_v47  ;;  %v2998_v25 = vadd.f32 %v2997_v1, %v2698_v26  ;;  %v2763_v8 = vmax.f32 %v1792_v46, 0.0  ;;  %v2701_v1 = vmax.f32 %v1841_v10, 0.0 }
 0x177   :  { %v1883_v54 = vpop.f32.mrf.mxu1  ;;  %v5196_v13 = vpop.f32.mrf.mxu0 }
 0x178   :  { %v2574_v21 = vmax.f32 %v1882_v42, 0.0  ;;  %v1884_v56 = vadd.f32 %v1883_v54, %v4661_v47  ;;  %v1833_v42 = vadd.f32 %v5102_v33, %v4649_v39  ;;  %v2999_v36 = vadd.f32 %v2998_v25, %v2699_v59 }
 0x179   :  { %v1885_v29 = vpop.f32.mrf.mxu1  ;;  %v5202_v48 = vpop.f32.mrf.mxu0  ;;  %v1835_v33 = vadd.f32 %v5107_v3, %v4649_v39 }
 0x17a   :  { %v2936_v51 = vadd.f32 %v2935_v58, %v2574_v21  ;;  %v2575_v0 = vmax.f32 %v1884_v56, 0.0  ;;  %v1843_v21 = vadd.f32 %v5118_v45, %v4665_v49  ;;  %v3031_v56 = vadd.f32 %v3030_v23, %v2762_v9 }
 0x17b   :  { %v1887_v32 = vpop.f32.mrf.mxu1  ;;  %v5208_v34 = vpop.f32.mrf.mxu0  ;;  %v1886_v11 = vadd.f32 %v1885_v29, %v4649_v39  ;;  %v3000_v9 = vadd.f32 %v2999_v36, %v2700_v17  ;;  %v2637_v3 = vmax.f32 %v1835_v33, 0.0 }
 0x17c   :  { %v5206_v35 = vadd.f32 %v2936_v51, %v2575_v0  ;;  %v2636_v51 = vmax.f32 %v1833_v42, 0.0  ;;  %v2764_v45 = vmax.f32 %v1843_v21, 0.0  ;;  %v3032_v53 = vadd.f32 %v3031_v56, %v2763_v8 }
 0x17d   :  { %v1891_v37 = vpop.f32.mrf.mxu1  ;;  %v5210_v16 = vpop.f32.mrf.mxu0  ;;  %v2638_v29 = vmax.f32 %v1886_v11, 0.0  ;;  %v1888_v56 = vadd.f32 %v1887_v32, %v4649_v39  ;;  %v3001_v17 = vadd.f32 %v3000_v9, %v2701_v1  ;;  %v1949_v1 = vadd.f32 %v5154_v41, %v4665_v49 }
 0x17e   :  { %v1892_v12 = vadd.f32 %v1891_v37, %v4690_v2  ;;  %v2967_v7 = vadd.f32 %v5179_v31, %v2636_v51  ;;  %v3033_v21 = vadd.f32 %v3032_v53, %v2764_v45  ;;  %v1945_v51 = vadd.f32 %v5146_v15, %v4690_v2 }
 0x17f   :  { %v1893_v58 = vpop.f32.mrf.mxu1  ;;  %v5215_v24 = vpop.f32.mrf.mxu0  ;;  %v1939_v45 = vadd.f32 %v5136_v18, %v4649_v39  ;;  %v2639_v20 = vmax.f32 %v1888_v56, 0.0  ;;  %v1947_v15 = vadd.f32 %v5149_v63, %v4690_v2  ;;  %v1935_v18 = vadd.f32 %v5126_v19, %v4661_v47 }
 0x180   :  { %v2702_v59 = vmax.f32 %v1892_v12, 0.0  ;;  %v1894_v23 = vadd.f32 %v1893_v58, %v4690_v2  ;;  %v2968_v36 = vadd.f32 %v2967_v7, %v2637_v3  ;;  %v3034_v53 = vadd.f32 %v3033_v21, %v2765_v43 }
 0x181   :  { %v1895_v54 = vpop.f32.mrf.mxu1  ;;  %v5219_v4 = vpop.f32.mrf.mxu0  ;;  %v2704_v7 = vmax.f32 %v1945_v51, 0.0  ;;  %v1941_v43 = vadd.f32 %v5141_v30, %v4649_v39  ;;  %v2768_v56 = vmax.f32 %v1949_v1, 0.0  ;;  %v1937_v19 = vadd.f32 %v5133_v52, %v4661_v47 }
 0x182   :  { %v1896_v37 = vadd.f32 %v1895_v54, %v4665_v49  ;;  %v3002_v58 = vadd.f32 %v3001_v17, %v2702_v59  ;;  %v2703_v12 = vmax.f32 %v1894_v23, 0.0  ;;  %v2969_v32 = vadd.f32 %v2968_v36, %v2638_v29 }
 0x183   :  { %v1897_v27 = vpop.f32.mrf.mxu1  ;;  %v5225_v62 = vpop.f32.mrf.mxu0  ;;  %v2640_v23 = vmax.f32 %v1939_v45, 0.0  ;;  %v1951_v17 = vadd.f32 %v5157_v6, %v4665_v49  ;;  %v2576_v30 = vmax.f32 %v1935_v18, 0.0 }
 0x184   :  { %v2766_v33 = vmax.f32 %v1896_v37, 0.0  ;;  %v1898_v31 = vadd.f32 %v1897_v27, %v4665_v49  ;;  %v3003_v37 = vadd.f32 %v3002_v58, %v2703_v12  ;;  %v2970_v21 = vadd.f32 %v2969_v32, %v2639_v20 }
 0x185   :  { %v5229_v0 = vpop.f32.mrf.mxu1  ;;  %v5232_v26 = vpop.f32.mrf.mxu0  ;;  %v2641_v12 = vmax.f32 %v1941_v43, 0.0  ;;  %v2938_v18 = vadd.f32 %v5206_v35, %v2576_v30  ;;  %v2041_v35 = vadd.f32 %v5162_v14, %v4661_v47 }
 0x186   :  { %v3035_v9 = vadd.f32 %v3034_v53, %v2766_v33  ;;  %v2767_v27 = vmax.f32 %v1898_v31, 0.0  ;;  %v2705_v31 = vmax.f32 %v1947_v15, 0.0  ;;  %v3004_v51 = vadd.f32 %v3003_v37, %v2704_v7 }
 0x187   :  { %v5237_v50 = vpop.f32.mrf.mxu1  ;;  %v5239_v46 = vpop.f32.mrf.mxu0  ;;  %v2971_v45 = vadd.f32 %v2970_v21, %v2640_v23  ;;  %v1988_v6 = vadd.f32 %v5229_v0, %v4661_v47  ;;  %v2769_v53 = vmax.f32 %v1951_v17, 0.0  ;;  %v2577_v7 = vmax.f32 %v1937_v19, 0.0 }
 0x188   :  { %v3036_v36 = vadd.f32 %v3035_v9, %v2767_v27  ;;  %v2045_v15 = vadd.f32 %v5171_v38, %v4649_v39  ;;  %v3005_v37 = vadd.f32 %v3004_v51, %v2705_v31  ;;  %v2051_v21 = vadd.f32 %v5177_v57, %v4690_v2 }
 0x189   :  { %v1991_v25 = vpop.f32.mrf.mxu1  ;;  %v5244_v42 = vpop.f32.mrf.mxu0  ;;  %v2972_v23 = vadd.f32 %v2971_v45, %v2641_v12  ;;  %v1990_v17 = vadd.f32 %v5237_v50, %v4661_v47  ;;  %v2939_v51 = vadd.f32 %v2938_v18, %v2577_v7  ;;  %v2053_v50 = vadd.f32 %v5181_v22, %v4690_v2 }
 0x18a   :  { %v1992_v63 = vadd.f32 %v1991_v25, %v4649_v39  ;;  %v3037_v1 = vadd.f32 %v3036_v36, %v2768_v56  ;;  %v2644_v45 = vmax.f32 %v2045_v15, 0.0  ;;  %v2057_v7 = vadd.f32 %v5185_v5, %v4665_v49 }
 0x18b   :  { %v1993_v8 = vpop.f32.mrf.mxu1  ;;  %v5247_v10 = vpop.f32.mrf.mxu0  ;;  %v2579_v14 = vmax.f32 %v1990_v17, 0.0  ;;  %v2580_v18 = vmax.f32 %v2041_v35, 0.0 }
 0x18c   :  { %v2642_v52 = vmax.f32 %v1992_v63, 0.0  ;;  %v1994_v9 = vadd.f32 %v1993_v8, %v4649_v39  ;;  %v3038_v63 = vadd.f32 %v3037_v1, %v2769_v53 }
 0x18d   :  { %v1997_v54 = vpop.f32.mrf.mxu1  ;;  %v5252_v28 = vpop.f32.mrf.mxu0 }
 0x18e   :  { %v1998_v41 = vadd.f32 %v1997_v54, %v4690_v2  ;;  %v2973_v38 = vadd.f32 %v2972_v23, %v2642_v52  ;;  %v2643_v36 = vmax.f32 %v1994_v9, 0.0  ;;  %v2709_v23 = vmax.f32 %v2053_v50, 0.0 }
 0x18f   :  { %v1999_v11 = vpop.f32.mrf.mxu1  ;;  %v5260_v59 = vpop.f32.mrf.mxu0  ;;  %v2151_v50 = vadd.f32 %v5202_v48, %v4649_v39 }
 0x190   :  { %v2706_v25 = vmax.f32 %v1998_v41, 0.0  ;;  %v2000_v20 = vadd.f32 %v1999_v11, %v4690_v2  ;;  %v2578_v41 = vmax.f32 %v1988_v6, 0.0  ;;  %v2974_v53 = vadd.f32 %v2973_v38, %v2643_v36 }
 0x191   :  { %v2001_v3 = vpop.f32.mrf.mxu1  ;;  %v5274_v58 = vpop.f32.mrf.mxu0  ;;  %v2773_v36 = vmax.f32 %v2057_v7, 0.0  ;;  %v2147_v7 = vadd.f32 %v5192_v40, %v4661_v47  ;;  %v2159_v40 = vadd.f32 %v5215_v24, %v4690_v2 }
 0x192   :  { %v2002_v54 = vadd.f32 %v2001_v3, %v4665_v49  ;;  %v3006_v8 = vadd.f32 %v3005_v37, %v2706_v25  ;;  %v2707_v56 = vmax.f32 %v2000_v20, 0.0  ;;  %v2047_v25 = vadd.f32 %v5174_v61, %v4649_v39 }
 0x193   :  { %v2003_v29 = vpop.f32.mrf.mxu1  ;;  %v5285_v3 = vpop.f32.mrf.mxu0  ;;  %v2940_v20 = vadd.f32 %v2939_v51, %v2578_v41  ;;  %v2043_v61 = vadd.f32 %v5167_v60, %v4661_v47  ;;  %v2975_v41 = vadd.f32 %v2974_v53, %v2644_v45 }
 0x194   :  { %v2770_v0 = vmax.f32 %v2002_v54, 0.0  ;;  %v2004_v43 = vadd.f32 %v2003_v29, %v4665_v49  ;;  %v2055_v29 = vadd.f32 %v5183_v55, %v4665_v49  ;;  %v2708_v54 = vmax.f32 %v2051_v21, 0.0 }
 0x195   :  { %v5270_v33 = vpop.f32.mrf.mxu1  ;;  %v5295_v31 = vpop.f32.mrf.mxu0  ;;  %v3007_v6 = vadd.f32 %v3006_v8, %v2707_v56  ;;  %v2941_v21 = vadd.f32 %v2940_v20, %v2579_v14 }
 0x196   :  { %v3039_v57 = vadd.f32 %v3038_v63, %v2770_v0  ;;  %v2771_v30 = vmax.f32 %v2004_v43, 0.0  ;;  %v2772_v9 = vmax.f32 %v2055_v29, 0.0  ;;  %v2645_v43 = vmax.f32 %v2047_v25, 0.0 }
 0x197   :  { %v5277_v32 = vpop.f32.mrf.mxu1  ;;  %v5303_v52 = vpop.f32.mrf.mxu0  ;;  %v3008_v0 = vadd.f32 %v3007_v6, %v2708_v54  ;;  %v2094_v17 = vadd.f32 %v5270_v33, %v4661_v47  ;;  %v2581_v29 = vmax.f32 %v2043_v61, 0.0  ;;  %v2153_v61 = vadd.f32 %v5208_v34, %v4649_v39 }
 0x198   :  { %v3040_v15 = vadd.f32 %v3039_v57, %v2771_v30  ;;  %v2942_v57 = vadd.f32 %v2941_v21, %v2580_v18  ;;  %v2976_v30 = vadd.f32 %v2975_v41, %v2645_v43  ;;  %v2648_v18 = vmax.f32 %v2151_v50, 0.0 }
 0x199   :  { %v2097_v27 = vpop.f32.mrf.mxu1  ;;  %v5314_v5 = vpop.f32.mrf.mxu0  ;;  %v3009_v51 = vadd.f32 %v3008_v0, %v2709_v23  ;;  %v2582_v6 = vmax.f32 %v2094_v17, 0.0  ;;  %v2161_v0 = vadd.f32 %v5219_v4, %v4665_v49  ;;  %v2163_v4 = vadd.f32 %v5225_v62, %v4665_v49 }
 0x19a   :  { %v2098_v37 = vadd.f32 %v2097_v27, %v4649_v39  ;;  %v3041_v63 = vadd.f32 %v3040_v15, %v2772_v9  ;;  %v2157_v9 = vadd.f32 %v5210_v16, %v4690_v2  ;;  %v2943_v15 = vadd.f32 %v2942_v57, %v2581_v29 }
 0x19b   :  { %v2099_v11 = vpop.f32.mrf.mxu1 }
 0x19c   :  { %v2100_v60 = vadd.f32 %v2099_v11, %v4649_v39  ;;  %v2096_v11 = vadd.f32 %v5277_v32, %v4661_v47  ;;  %v2944_v43 = vadd.f32 %v2943_v15, %v2582_v6 }
 0x19d   :  { %v2103_v19 = vpop.f32.mrf.mxu1 }
 0x19e   :  { %v2104_v55 = vadd.f32 %v2103_v19, %v4690_v2  ;;  %v2646_v19 = vmax.f32 %v2098_v37, 0.0  ;;  %v2647_v53 = vmax.f32 %v2100_v60, 0.0  ;;  %v2583_v21 = vmax.f32 %v2096_v11, 0.0 }
 0x19f   :  { %v2105_v12 = vpop.f32.mrf.mxu1 }
 0x1a0   :  { %v2710_v38 = vmax.f32 %v2104_v55, 0.0  ;;  %v2106_v27 = vadd.f32 %v2105_v12, %v4690_v2  ;;  %v5323_v12 = vpop.f32.mrf.mxu0  ;;  %v2977_v14 = vadd.f32 %v2976_v30, %v2646_v19  ;;  %v2649_v19 = vmax.f32 %v2153_v61, 0.0 }
 0x1a1   :  { %v2107_v1 = vpop.f32.mrf.mxu1  ;;  %v2945_v57 = vadd.f32 %v2944_v43, %v2583_v21  ;;  %v2263_v21 = vadd.f32 %v5252_v28, %v4690_v2 }
 0x1a2   :  { %v2108_v8 = vadd.f32 %v2107_v1, %v4665_v49  ;;  %v3010_v25 = vadd.f32 %v3009_v51, %v2710_v38  ;;  %v2711_v20 = vmax.f32 %v2106_v27, 0.0  ;;  %v3042_v1 = vadd.f32 %v3041_v63, %v2773_v36  ;;  %v5333_v23 = vpop.f32.mrf.mxu0 }
 0x1a3   :  { %v2109_v22 = vpop.f32.mrf.mxu1  ;;  %v2978_v16 = vadd.f32 %v2977_v14, %v2647_v53  ;;  %v2584_v38 = vmax.f32 %v2147_v7, 0.0  ;;  %v2149_v63 = vadd.f32 %v5196_v13, %v4661_v47  ;;  %v2776_v51 = vmax.f32 %v2161_v0, 0.0 }
 0x1a4   :  { %v2774_v45 = vmax.f32 %v2108_v8, 0.0  ;;  %v2110_v54 = vadd.f32 %v2109_v22, %v4665_v49  ;;  %v3011_v32 = vadd.f32 %v3010_v25, %v2711_v20  ;;  %v2712_v8 = vmax.f32 %v2157_v9, 0.0  ;;  %v5345_v29 = vpop.f32.mrf.mxu0 }
 0x1a5   :  { %v2199_v56 = vpop.f32.mrf.mxu1  ;;  %v2979_v24 = vadd.f32 %v2978_v16, %v2648_v18  ;;  %v2585_v11 = vmax.f32 %v2149_v63, 0.0  ;;  %v2777_v14 = vmax.f32 %v2163_v4, 0.0  ;;  %v2946_v9 = vadd.f32 %v2945_v57, %v2584_v38 }
 0x1a6   :  { %v3043_v48 = vadd.f32 %v3042_v1, %v2774_v45  ;;  %v2775_v37 = vmax.f32 %v2110_v54, 0.0  ;;  %v3012_v60 = vadd.f32 %v3011_v32, %v2712_v8  ;;  %v2713_v54 = vmax.f32 %v2159_v40, 0.0  ;;  %v5351_v53 = vpop.f32.mrf.mxu0 }
 0x1a7   :  { %v5318_v35 = vpop.f32.mrf.mxu1  ;;  %v2980_v7 = vadd.f32 %v2979_v24, %v2649_v19  ;;  %v2947_v8 = vadd.f32 %v2946_v9, %v2585_v11 }
 0x1a8   :  { %v3044_v27 = vadd.f32 %v3043_v48, %v2775_v37  ;;  %v3013_v1 = vadd.f32 %v3012_v60, %v2713_v54  ;;  %v2202_v61 = vadd.f32 %v5318_v35, %v4661_v47  ;;  %v5360_v16 = vpop.f32.mrf.mxu0  ;;  %v2265_v35 = vadd.f32 %v5260_v59, %v4690_v2 }
 0x1a9   :  { %v2203_v33 = vpop.f32.mrf.mxu1  ;;  %v2716_v60 = vmax.f32 %v2263_v21, 0.0  ;;  %v2269_v54 = vadd.f32 %v5285_v3, %v4665_v49 }
 0x1aa   :  { %v2204_v34 = vadd.f32 %v2203_v33, %v4649_v39  ;;  %v2200_v33 = vadd.f32 %v2199_v56, %v4661_v47  ;;  %v3045_v13 = vadd.f32 %v3044_v27, %v2776_v51  ;;  %v2253_v27 = vadd.f32 %v5232_v26, %v4661_v47 }
 0x1ab   :  { %v2205_v55 = vpop.f32.mrf.mxu1  ;;  %v2587_v63 = vmax.f32 %v2202_v61, 0.0  ;;  %v2259_v26 = vadd.f32 %v5247_v10, %v4649_v39 }
 0x1ac   :  { %v2650_v25 = vmax.f32 %v2204_v34, 0.0  ;;  %v2206_v20 = vadd.f32 %v2205_v55, %v4649_v39  ;;  %v2586_v56 = vmax.f32 %v2200_v33, 0.0  ;;  %v3046_v0 = vadd.f32 %v3045_v13, %v2777_v14 }
 0x1ad   :  { %v2209_v22 = vpop.f32.mrf.mxu1 }
 0x1ae   :  { %v2210_v17 = vadd.f32 %v2209_v22, %v4690_v2  ;;  %v2981_v55 = vadd.f32 %v2980_v7, %v2650_v25  ;;  %v2651_v32 = vmax.f32 %v2206_v20, 0.0  ;;  %v2948_v28 = vadd.f32 %v2947_v8, %v2586_v56 }
 0x1af   :  { %v2211_v41 = vpop.f32.mrf.mxu1  ;;  %v2653_v7 = vmax.f32 %v2259_v26, 0.0 }
 0x1b0   :  { %v2714_v50 = vmax.f32 %v2210_v17, 0.0  ;;  %v2212_v6 = vadd.f32 %v2211_v41, %v4690_v2  ;;  %v2257_v41 = vadd.f32 %v5244_v42, %v4649_v39  ;;  %v2982_v19 = vadd.f32 %v2981_v55, %v2651_v32  ;;  %v5370_v42 = vpop.f32.mrf.mxu0 }
 0x1b1   :  { %v2213_v36 = vpop.f32.mrf.mxu1  ;;  %v2949_v13 = vadd.f32 %v2948_v28, %v2587_v63 }
 0x1b2   :  { %v2214_v30 = vadd.f32 %v2213_v36, %v4665_v49  ;;  %v3014_v22 = vadd.f32 %v3013_v1, %v2714_v50  ;;  %v2715_v18 = vmax.f32 %v2212_v6, 0.0  ;;  %v2267_v36 = vadd.f32 %v5274_v58, %v4665_v49  ;;  %v5380_v11 = vpop.f32.mrf.mxu0 }
 0x1b3   :  { %v2215_v45 = vpop.f32.mrf.mxu1  ;;  %v2652_v57 = vmax.f32 %v2257_v41, 0.0  ;;  %v2255_v58 = vadd.f32 %v5239_v46, %v4661_v47  ;;  %v2717_v50 = vmax.f32 %v2265_v35, 0.0 }
 0x1b4   :  { %v2778_v15 = vmax.f32 %v2214_v30, 0.0  ;;  %v2216_v48 = vadd.f32 %v2215_v45, %v4665_v49  ;;  %v3015_v34 = vadd.f32 %v3014_v22, %v2715_v18  ;;  %v2588_v45 = vmax.f32 %v2253_v27, 0.0 }
 0x1b5   :  { %v2305_v62 = vpop.f32.mrf.mxu1  ;;  %v2780_v6 = vmax.f32 %v2267_v36, 0.0  ;;  %v2983_v25 = vadd.f32 %v2982_v19, %v2652_v57  ;;  %v2589_v56 = vmax.f32 %v2255_v58, 0.0  ;;  %v2781_v22 = vmax.f32 %v2269_v54, 0.0 }
 0x1b6   :  { %v3047_v40 = vadd.f32 %v3046_v0, %v2778_v15  ;;  %v2779_v17 = vmax.f32 %v2216_v48, 0.0  ;;  %v3016_v33 = vadd.f32 %v3015_v34, %v2716_v60  ;;  %v2306_v10 = vadd.f32 %v2305_v62, %v4661_v47 }
 0x1b7   :  { %v5354_v37 = vpop.f32.mrf.mxu1  ;;  %v2950_v61 = vadd.f32 %v2949_v13, %v2588_v45  ;;  %v2984_v55 = vadd.f32 %v2983_v25, %v2653_v7  ;;  %v2369_v34 = vadd.f32 %v5333_v23, %v4690_v2  ;;  %v2363_v36 = vadd.f32 %v5314_v5, %v4649_v39 }
 0x1b8   :  { %v3048_v24 = vadd.f32 %v3047_v40, %v2779_v17  ;;  %v3017_v18 = vadd.f32 %v3016_v33, %v2717_v50  ;;  %v2590_v21 = vmax.f32 %v2306_v10, 0.0  ;;  %v2308_v40 = vadd.f32 %v5354_v37, %v4661_v47 }
 0x1b9   :  { %v2309_v43 = vpop.f32.mrf.mxu1  ;;  %v2951_v28 = vadd.f32 %v2950_v61, %v2589_v56  ;;  %v2373_v37 = vadd.f32 %v5351_v53, %v4665_v49  ;;  %v2359_v23 = vadd.f32 %v5295_v31, %v4661_v47  ;;  %v2371_v5 = vadd.f32 %v5345_v29, %v4690_v2 }
 0x1ba   :  { %v2310_v59 = vadd.f32 %v2309_v43, %v4649_v39  ;;  %v3049_v46 = vadd.f32 %v3048_v24, %v2780_v6  ;;  %v5387_v43 = vpop.f32.mrf.mxu0  ;;  %v2591_v26 = vmax.f32 %v2308_v40, 0.0  ;;  %v2656_v45 = vmax.f32 %v2363_v36, 0.0 }
 0x1bb   :  { %v2311_v38 = vpop.f32.mrf.mxu1  ;;  %v2952_v57 = vadd.f32 %v2951_v28, %v2590_v21  ;;  %v2365_v58 = vadd.f32 %v5323_v12, %v4649_v39  ;;  %v2784_v25 = vmax.f32 %v2373_v37, 0.0  ;;  %v2375_v31 = vadd.f32 %v5360_v16, %v4665_v49 }
 0x1bc   :  { %v2654_v15 = vmax.f32 %v2310_v59, 0.0  ;;  %v2312_v3 = vadd.f32 %v2311_v38, %v4649_v39  ;;  %v3050_v27 = vadd.f32 %v3049_v46, %v2781_v22  ;;  %v5395_v60 = vpop.f32.mrf.mxu0  ;;  %v2592_v29 = vmax.f32 %v2359_v23, 0.0 }
 0x1bd   :  { %v2315_v4 = vpop.f32.mrf.mxu1  ;;  %v2657_v7 = vmax.f32 %v2365_v58, 0.0  ;;  %v2361_v56 = vadd.f32 %v5303_v52, %v4661_v47 }
 0x1be   :  { %v2316_v51 = vadd.f32 %v2315_v4, %v4690_v2  ;;  %v2985_v17 = vadd.f32 %v2984_v55, %v2654_v15  ;;  %v2655_v38 = vmax.f32 %v2312_v3, 0.0  ;;  %v2474_v53 = vpop.f32.mrf.mxu0  ;;  %v2785_v55 = vmax.f32 %v2375_v31, 0.0 }
 0x1bf   :  { %v2317_v30 = vpop.f32.mrf.mxu1  ;;  %v2593_v52 = vmax.f32 %v2361_v56, 0.0  ;;  %v2475_v28 = vadd.f32 %v2474_v53, %v4690_v2 }
 0x1c0   :  { %v2718_v14 = vmax.f32 %v2316_v51, 0.0  ;;  %v2318_v1 = vadd.f32 %v2317_v30, %v4690_v2  ;;  %v2986_v24 = vadd.f32 %v2985_v17, %v2655_v38  ;;  %v2720_v30 = vmax.f32 %v2369_v34, 0.0  ;;  %v2476_v22 = vpop.f32.mrf.mxu0 }
 0x1c1   :  { %v2319_v20 = vpop.f32.mrf.mxu1  ;;  %v2477_v58 = vadd.f32 %v2476_v22, %v4690_v2 }
 0x1c2   :  { %v2320_v9 = vadd.f32 %v2319_v20, %v4665_v49  ;;  %v3018_v41 = vadd.f32 %v3017_v18, %v2718_v14  ;;  %v2719_v8 = vmax.f32 %v2318_v1, 0.0  ;;  %v2953_v20 = vadd.f32 %v2952_v57, %v2591_v26 }
 0x1c3   :  { %v2321_v48 = vpop.f32.mrf.mxu1  ;;  %v2987_v10 = vadd.f32 %v2986_v24, %v2656_v45  ;;  %v2721_v1 = vmax.f32 %v2371_v5, 0.0  ;;  %v2724_v45 = vmax.f32 %v2475_v28, 0.0 }
 0x1c4   :  { %v2782_v32 = vmax.f32 %v2320_v9, 0.0  ;;  %v2322_v0 = vadd.f32 %v2321_v48, %v4665_v49  ;;  %v3019_v51 = vadd.f32 %v3018_v41, %v2719_v8 }
 0x1c5   :  { %v2411_v62 = vpop.f32.mrf.mxu1 }
 0x1c6   :  { %v3051_v63 = vadd.f32 %v3050_v27, %v2782_v32  ;;  %v2783_v19 = vmax.f32 %v2322_v0, 0.0  ;;  %v3020_v6 = vadd.f32 %v3019_v51, %v2720_v30  ;;  %v2412_v16 = vadd.f32 %v2411_v62, %v4661_v47  ;;  %v2478_v62 = vpop.f32.mrf.mxu0 }
 0x1c7   :  { %v2413_v35 = vpop.f32.mrf.mxu1  ;;  %v2954_v32 = vadd.f32 %v2953_v20, %v2592_v29  ;;  %v2988_v0 = vadd.f32 %v2987_v10, %v2657_v7  ;;  %v2479_v23 = vadd.f32 %v2478_v62, %v4665_v49 }
 0x1c8   :  { %v3052_v54 = vadd.f32 %v3051_v63, %v2783_v19  ;;  %v3021_v18 = vadd.f32 %v3020_v6, %v2721_v1  ;;  %v2594_v63 = vmax.f32 %v2412_v16, 0.0  ;;  %v2414_v19 = vadd.f32 %v2413_v35, %v4661_v47 }
 0x1c9   :  { %v2415_v4 = vpop.f32.mrf.mxu1  ;;  %v2955_v26 = vadd.f32 %v2954_v32, %v2593_v52  ;;  %v2788_v31 = vmax.f32 %v2479_v23, 0.0  ;;  %v2725_v1 = vmax.f32 %v2477_v58, 0.0  ;;  %v3132_v23 = vld [vmem:[%s5739_s4 + $0xe0] sm:$0xff]  ;;  %v3130_v58 = vld [vmem:[%s5739_s4 + $0xd0] sm:$0xff] }
 0x1ca   :  { %v2416_v33 = vadd.f32 %v2415_v4, %v4649_v39  ;;  %v3053_v46 = vadd.f32 %v3052_v54, %v2784_v25  ;;  %v2469_v4 = vadd.f32 %v5387_v43, %v4649_v39  ;;  %v2480_v54 = vpop.f32.mrf.mxu0  ;;  %v2471_v43 = vadd.f32 %v5395_v60, %v4649_v39 }
 0x1cb   :  { %v2417_v59 = vpop.f32.mrf.mxu1  ;;  %v2956_v35 = vadd.f32 %v2955_v26, %v2594_v63  ;;  %v2481_v20 = vadd.f32 %v2480_v54, %v4665_v49  ;;  %v3072_v26 = vld [vmem:[%s5740_s3] sm:$0xff]  ;;  %v3115_v54 = vld [vmem:[%s5739_s4 + $0x58] sm:$0xff] }
 0x1cc   :  { %v2658_v15 = vmax.f32 %v2416_v33, 0.0  ;;  %v2418_v3 = vadd.f32 %v2417_v59, %v4649_v39  ;;  %v3054_v34 = vadd.f32 %v3053_v46, %v2785_v55  ;;  %v2465_v59 = vadd.f32 %v5370_v42, %v4661_v47  ;;  %4040 = vmatprep.mubr.msk.f32.mxu0 %vm833_vm0, %v3072_v26  ;;  %v3083_v26 = vld [vmem:[%s5740_s3 + $0x58] sm:$0xff] }
 0x1cd   :  { %v2421_v50 = vpop.f32.mrf.mxu1  ;;  %v2595_v33 = vmax.f32 %v2414_v19, 0.0  ;;  %v2467_v42 = vadd.f32 %v5380_v11, %v4661_v47  ;;  %v2661_v7 = vmax.f32 %v2471_v43, 0.0  ;;  %v3113_v43 = vld [vmem:[%s5739_s4 + $0x48] sm:$0xff] }
 0x1ce   :  { %v2422_v13 = vadd.f32 %v2421_v50, %v4690_v2  ;;  %v2989_v38 = vadd.f32 %v2988_v0, %v2658_v15  ;;  %v2659_v27 = vmax.f32 %v2418_v3, 0.0  ;;  %v2660_v50 = vmax.f32 %v2469_v4, 0.0 }
 0x1cf   :  { %v2423_v14 = vpop.f32.mrf.mxu1  ;;  %v2596_v29 = vmax.f32 %v2465_v59, 0.0  ;;  %v2597_v16 = vmax.f32 %v2467_v42, 0.0  ;;  %v3118_v59 = vld [vmem:[%s5739_s4 + $0x70] sm:$0xff]  ;;  %v3125_v42 = vld [vmem:[%s5739_s4 + $0xa8] sm:$0xff] }
 0x1d0   :  { %v2722_v9 = vmax.f32 %v2422_v13, 0.0  ;;  %v2424_v12 = vadd.f32 %v2423_v14, %v4690_v2  ;;  %v2990_v30 = vadd.f32 %v2989_v38, %v2659_v27 }
 0x1d1   :  { %v2425_v48 = vpop.f32.mrf.mxu1 }
 0x1d2   :  { %v2426_v61 = vadd.f32 %v2425_v48, %v4665_v49  ;;  %v3022_v41 = vadd.f32 %v3021_v18, %v2722_v9  ;;  %v2723_v8 = vmax.f32 %v2424_v12, 0.0  ;;  %v2991_v10 = vadd.f32 %v2990_v30, %v2660_v50  ;;  %v3117_v30 = vld [vmem:[%s5739_s4 + $0x68] sm:$0xff]  ;;  %v3128_v50 = vld [vmem:[%s5739_s4 + $0xc0] sm:$0xff] }
 0x1d3   :  { %v2427_v21 = vpop.f32.mrf.mxu1  ;;  %v2957_v9 = vadd.f32 %v2956_v35, %v2595_v33  ;;  %v2789_v18 = vmax.f32 %v2481_v20, 0.0  ;;  %v3129_v35 = vld [vmem:[%s5739_s4 + $0xc8] sm:$0xff]  ;;  %v3114_v33 = vld [vmem:[%s5739_s4 + $0x50] sm:$0xff]  ;;  %v3124_v20 = vld [vmem:[%s5739_s4 + $0xa0] sm:$0xff] }
 0x1d4   :  { %v2786_v40 = vmax.f32 %v2426_v61, 0.0  ;;  %v2428_v17 = vadd.f32 %v2427_v21, %v4665_v49  ;;  %v3023_v24 = vadd.f32 %v3022_v41, %v2723_v8  ;;  %v2992_v61 = vadd.f32 %v2991_v10, %v2661_v7  ;;  %v3109_v10 = vld [vmem:[%s5739_s4 + $0x28] sm:$0xff]  ;;  %v3106_v7 = vld [vmem:[%s5739_s4 + $0x10] sm:$0xff] }
 0x1d5   :  { %v2517_v36 = vpop.f32.mrf.mxu1  ;;  %v2958_v32 = vadd.f32 %v2957_v9, %v2596_v29  ;;  %v3108_v29 = vld [vmem:[%s5739_s4 + $0x20] sm:$0xff]  ;;  %v3107_v9 = vld [vmem:[%s5739_s4 + $0x18] sm:$0xff] }
 0x1d6   :  { %v3055_v51 = vadd.f32 %v3054_v34, %v2786_v40  ;;  %v2787_v37 = vmax.f32 %v2428_v17, 0.0  ;;  %v3024_v25 = vadd.f32 %v3023_v24, %v2724_v45  ;;  %v2518_v46 = vadd.f32 %v2517_v36, %v4661_v47  ;;  %v3133_v24 = vld [vmem:[%s5739_s4 + $0xe8] sm:$0xff]  ;;  %v3116_v45 = vld [vmem:[%s5739_s4 + $0x60] sm:$0xff] }
 0x1d7   :  { %v2519_v57 = vpop.f32.mrf.mxu1  ;;  %v2959_v52 = vadd.f32 %v2958_v32, %v2597_v16 }
 0x1d8   :  { %v3056_v53 = vadd.f32 %v3055_v51, %v2787_v37  ;;  %v3025_v11 = vadd.f32 %v3024_v25, %v2725_v1  ;;  %v2598_v8 = vmax.f32 %v2518_v46, 0.0  ;;  %v2520_v40 = vadd.f32 %v2519_v57, %v4661_v47  ;;  %v5746_v47 = vld [vmem:[#allocation2_spill] sm:$0xff]  ;;  %v3119_v57 = vld [vmem:[%s5739_s4 + $0x78] sm:$0xff]  ;;  %v3122_v1 = vld [vmem:[%s5739_s4 + $0x90] sm:$0xff] }
 0x1d9   :  { %v2521_v5 = vpop.f32.mrf.mxu1  ;;  %v3111_v25 = vld [vmem:[%s5739_s4 + $0x38] sm:$0xff]  ;;  %v3105_v46 = vld [vmem:[%s5739_s4 + $0x8] sm:$0xff] }
 0x1da   :  { %v2522_v6 = vadd.f32 %v2521_v5, %v4649_v39  ;;  %v3057_v60 = vadd.f32 %v3056_v53, %v2788_v31  ;;  %v2960_v63 = vadd.f32 %v2959_v52, %v2598_v8  ;;  %v2599_v19 = vmax.f32 %v2520_v40, 0.0  ;;  %v3131_v5 = vld [vmem:[%s5739_s4 + $0xd8] sm:$0xff]  ;;  %v3110_v31 = vld [vmem:[%s5739_s4 + $0x30] sm:$0xff] }
 0x1db   :  { %v2523_v13 = vpop.f32.mrf.mxu1  ;;  %v3127_v53 = vld [vmem:[%s5739_s4 + $0xb8] sm:$0xff] }
 0x1dc   :  { %v2662_v15 = vmax.f32 %v2522_v6, 0.0  ;;  %v2524_v48 = vadd.f32 %v2523_v13, %v4649_v39  ;;  %v3058_v38 = vadd.f32 %v3057_v60, %v2789_v18  ;;  %v2961_v37 = vadd.f32 %v2960_v63, %v2599_v19  ;;  %v3112_v6 = vld [vmem:[%s5739_s4 + $0x40] sm:$0xff]  ;;  %v3126_v13 = vld [vmem:[%s5739_s4 + $0xb0] sm:$0xff]  ;;  %v3075_v63 = vld [vmem:[%s5740_s3 + $0x18] sm:$0xff] }
 0x1dd   :  { %v2527_v14 = vpop.f32.mrf.mxu1  ;;  %v3120_v60 = vld [vmem:[%s5739_s4 + $0x80] sm:$0xff] }
 0x1de   :  { %v2528_v12 = vadd.f32 %v2527_v14, %v4690_v2  ;;  %v2993_v17 = vadd.f32 %v2992_v61, %v2662_v15  ;;  %v2663_v39 = vmax.f32 %v2524_v48, 0.0  ;;  %v3123_v14 = vld [vmem:[%s5739_s4 + $0x98] sm:$0xff]  ;;  %v3650_v15 = vld [vmem:[%s5741_s6] sm:$0x7] }
 0x1df   :  { %v2529_v3 = vpop.f32.mrf.mxu1  ;;  %v3076_v19 = vld [vmem:[%s5740_s3 + $0x20] sm:$0xff] }
 0x1e0   :  { %v2726_v56 = vmax.f32 %v2528_v12, 0.0  ;;  %v2530_v22 = vadd.f32 %v2529_v3, %v4690_v2  ;;  %v2994_v51 = vadd.f32 %v2993_v17, %v2663_v39  ;;  %v3121_v12 = vld [vmem:[%s5739_s4 + $0x88] sm:$0xff]  ;;  %v3104_v3 = vld [vmem:[%s5739_s4] sm:$0xff] }
 0x1e1   :  { %v2531_v55 = vpop.f32.mrf.mxu1 }
 0x1e2   :  { %v3026_v0 = vadd.f32 %v3025_v11, %v2726_v56  ;;  %v2727_v21 = vmax.f32 %v2530_v22, 0.0  ;;  %v2532_v41 = vadd.f32 %v2531_v55, %v4665_v49  ;;  %v2792_v56 = vlaneseq }
 0x1e3   :  { %v2533_v27 = vpop.f32.mrf.mxu1 }
 0x1e4   :  { %v2790_v34 = vmax.f32 %v2532_v41, 0.0  ;;  %v2534_v36 = vadd.f32 %v2533_v27, %v4665_v49  ;;  %v3027_v2 = vadd.f32 %v3026_v0, %v2727_v21  ;;  %v3135_v49 = vld [vmem:[%s5739_s4 + $0xf8] sm:$0xff]  ;;  %v2793_v11 = vand.u32 127, %v2792_v56 }
 0x1e6   :  { %v3059_v28 = vadd.f32 %v3058_v38, %v2790_v34  ;;  %v2791_v62 = vmax.f32 %v2534_v36, 0.0  ;;  %3028 = vadd.xlane.f32.xlu0 %v3027_v2  ;;  %vm2926_vm1 = vcmp.eq.s32.totalorder %v2793_v11, 0  ;;  %vm3063_vm2 = vcmp.eq.s32.totalorder %v2793_v11, 1 }
 0x1e8   :  { %v3060_v4 = vadd.f32 %v3059_v28, %v2791_v62  ;;  %v3073_v28 = vld [vmem:[%s5740_s3 + $0x8] sm:$0xff]  ;;  %v3074_v62 = vld [vmem:[%s5740_s3 + $0x10] sm:$0xff] }
 0x1ea   :  { %3061 = vadd.xlane.f32.xlu1 %v3060_v4  ;;  %2995 = vadd.xlane.f32.xlu0 %v2994_v51  ;;  %v3077_v4 = vld [vmem:[%s5740_s3 + $0x28] sm:$0xff]  ;;  %v3078_v51 = vld [vmem:[%s5740_s3 + $0x30] sm:$0xff] }
 0x1ee   :  { %2962 = vadd.xlane.f32.xlu0 %v2961_v37  ;;  %2858 = vadd.xlane.f32.xlu1 %v5151_v44  ;;  %v3134_v44 = vld [vmem:[%s5739_s4 + $0xf0] sm:$0xff]  ;;  %v3079_v37 = vld [vmem:[%s5740_s3 + $0x38] sm:$0xff] }
 0x1ef   :  { %v2892_v48 = vpop.xlane.xlu0 %2891 }
 0x1f0   :  { %v2929_v18 = vsel %vm2926_vm1, %v2892_v48, 0.0 }
 0x1f2   :  { %2825 = vadd.xlane.f32.xlu1 %v5746_v47  ;;  %v3080_v47 = vld [vmem:[%s5740_s3 + $0x40] sm:$0xff] }
 0x1f3   :  { %v2925_v22 = vpop.xlane.xlu0 %2924 }
 0x1f4   :  { %v2930_v61 = vsel %vm2926_vm1, %v2925_v22, 0.0 }
 0x203   :  { %3293 = vperm.xlu1 %4094, %v3135_v49   ;;  %v3081_v49 = vld [vmem:[%s5740_s3 + $0x48] sm:$0xff] }
 0x204   :  { %3213 = vperm.xlu0 %4093, %v3119_v57   ;;  %v3082_v57 = vld [vmem:[%s5740_s3 + $0x50] sm:$0xff] }
 0x207   :  { %3288 = vperm.xlu1 %4094, %v3134_v44   ;;  %v3084_v44 = vld [vmem:[%s5740_s3 + $0x60] sm:$0xff] }
 0x208   :  { %3283 = vperm.xlu0 %4093, %v3133_v24   ;;  %v3085_v24 = vld [vmem:[%s5740_s3 + $0x68] sm:$0xff] }
 0x20b   :  { %3208 = vperm.xlu1 %4094, %v3118_v59   ;;  %v3086_v59 = vld [vmem:[%s5740_s3 + $0x70] sm:$0xff] }
 0x20c   :  { %3278 = vperm.xlu0 %4093, %v3132_v23   ;;  %v3087_v23 = vld [vmem:[%s5740_s3 + $0x78] sm:$0xff] }
 0x20f   :  { %3203 = vperm.xlu1 %4094, %v3117_v30   ;;  %v3088_v30 = vld [vmem:[%s5740_s3 + $0x80] sm:$0xff] }
 0x210   :  { %3273 = vperm.xlu0 %4093, %v3131_v5   ;;  %v3089_v5 = vld [vmem:[%s5740_s3 + $0x88] sm:$0xff] }
 0x213   :  { %3198 = vperm.xlu1 %4094, %v3116_v45   ;;  %v3090_v45 = vld [vmem:[%s5740_s3 + $0x90] sm:$0xff] }
 0x214   :  { %3268 = vperm.xlu0 %4093, %v3130_v58   ;;  %v3091_v58 = vld [vmem:[%s5740_s3 + $0x98] sm:$0xff] }
 0x217   :  { %3193 = vperm.xlu1 %4094, %v3115_v54   ;;  %v3092_v54 = vld [vmem:[%s5740_s3 + $0xa0] sm:$0xff] }
 0x218   :  { %3263 = vperm.xlu0 %4093, %v3129_v35   ;;  %v3093_v35 = vld [vmem:[%s5740_s3 + $0xa8] sm:$0xff] }
 0x21b   :  { %3188 = vperm.xlu1 %4094, %v3114_v33   ;;  %v3094_v33 = vld [vmem:[%s5740_s3 + $0xb0] sm:$0xff] }
 0x21c   :  { %3258 = vperm.xlu0 %4093, %v3128_v50   ;;  %v3095_v50 = vld [vmem:[%s5740_s3 + $0xb8] sm:$0xff] }
 0x21f   :  { %3183 = vperm.xlu1 %4094, %v3113_v43   ;;  %v3096_v43 = vld [vmem:[%s5740_s3 + $0xc0] sm:$0xff] }
 0x220   :  { %3253 = vperm.xlu0 %4093, %v3127_v53   ;;  %v3097_v53 = vld [vmem:[%s5740_s3 + $0xc8] sm:$0xff] }
 0x223   :  { %3178 = vperm.xlu1 %4094, %v3112_v6   ;;  %v3098_v6 = vld [vmem:[%s5740_s3 + $0xd0] sm:$0xff] }
 0x224   :  { %3248 = vperm.xlu0 %4093, %v3126_v13   ;;  %v3099_v13 = vld [vmem:[%s5740_s3 + $0xd8] sm:$0xff] }
 0x227   :  { %3173 = vperm.xlu1 %4094, %v3111_v25   ;;  %v3100_v25 = vld [vmem:[%s5740_s3 + $0xe0] sm:$0xff] }
 0x228   :  { %3243 = vperm.xlu0 %4093, %v3125_v42   ;;  %v3101_v42 = vld [vmem:[%s5740_s3 + $0xe8] sm:$0xff] }
 0x22b   :  { %3168 = vperm.xlu1 %4094, %v3110_v31   ;;  %v3102_v31 = vld [vmem:[%s5740_s3 + $0xf0] sm:$0xff] }
 0x22c   :  { %3238 = vperm.xlu0 %4093, %v3124_v20   ;;  %v3103_v20 = vld [vmem:[%s5740_s3 + $0xf8] sm:$0xff] }
 0x22f   :  { %3163 = vperm.xlu1 %4094, %v3109_v10   ;;  %v5677_v10 = vld [vmem:[%s5742_s5] sm:$0x77] }
 0x230   :  { %3233 = vperm.xlu0 %4093, %v3123_v14   ;;  %5747 = vst [vmem:[#allocation2_spill] sm:$0xff] %v5677_v10  ;;  %v3657_v14 = vcombine.high %v5677_v10, %v5677_v10 }
 0x232   :  { %3723 = vmatprep.mubr.f32.mxu1 %v3657_v14 }
 0x233   :  { %3158 = vperm.xlu1 %4094, %v3108_v29  }
 0x234   :  { %3228 = vperm.xlu0 %4093, %v3122_v1  }
 0x237   :  { %3153 = vperm.xlu1 %4094, %v3107_v9  }
 0x238   :  { %3223 = vperm.xlu0 %4093, %v3121_v12  }
 0x23b   :  { %3148 = vperm.xlu1 %4094, %v3106_v7  }
 0x23c   :  { %3218 = vperm.xlu0 %4093, %v3120_v60  }
 0x23f   :  { %3143 = vperm.xlu1 %4094, %v3105_v46  }
 0x240   :  { %3653 = vperm.xlu0 %4093, %v3650_v15  }
 0x243   :  { %3138 = vperm.xlu1 %4094, %v3104_v3  }
 0x26f   :  { %v3029_v16 = vpop.xlane.xlu0 %3028 }
 0x270   :  { %v3066_v32 = vsel %vm3063_vm2, %v3029_v16, %v2929_v18 }
 0x271   :  { %v3070_v8 = vmul.f32 0.00024414063, %v3066_v32 }
 0x273   :  { %v3062_v55 = vpop.xlane.xlu1 %3061  ;;  %v2996_v41 = vpop.xlane.xlu0 %2995 }
 0x274   :  { %v3067_v0 = vsel %vm3063_vm2, %v3062_v55, %v2930_v61 }
 0x275   :  { %v3071_v21 = vmul.f32 0.00024414063, %v3067_v0 }
 0x277   :  { %4032 = vmatprep.subr.mxu0 %v3071_v21  ;;  %v2859_v40 = vpop.xlane.xlu1 %2858  ;;  %v2963_v34 = vpop.xlane.xlu0 %2962 }
 0x278   :  { %v2928_v17 = vsel %vm2926_vm1, %v2859_v40, 0.0  ;;  %4033 = vmatpush3.msra.mxu0 %v3071_v21 }
 0x279   :  { %v3065_v38 = vsel %vm3063_vm2, %v2996_v41, %v2928_v17  ;;  %4034 = vmatprep.subr.mxu0 %v3070_v8 }
 0x27a   :  { %v3069_v27 = vmul.f32 0.00024414063, %v3065_v38  ;;  %4035 = vmatpush3.msra.mxu0 %v3070_v8 }
 0x27b   :  { %v2826_v39 = vpop.xlane.xlu1 %2825 }
 0x27c   :  { %v2927_v36 = vsel %vm2926_vm1, %v2826_v39, 0.0  ;;  %4036 = vmatprep.subr.mxu0 %v3069_v27 }
 0x27d   :  { %v3064_v2 = vsel %vm3063_vm2, %v2963_v34, %v2927_v36  ;;  %4037 = vmatpush3.msra.mxu0 %v3069_v27 }
 0x27e   :  { %v3068_v52 = vmul.f32 0.00024414063, %v3064_v2 }
 0x27f   :  { %v3294_v29 = vpop.permute.xlu1 %3293  ;;  %v3214_v7 = vpop.permute.xlu0 %3213 }
 0x280   :  { %4038 = vmatprep.subr.mxu0 %v3068_v52 }
 0x281   :  { %4039 = vmatpush3.msra.mxu0 %v3068_v52 }
 0x282   :  { %4041 = vmatmul.mubr.msk.f32.vlgmr.msra.gmra.mxu0 %vm833_vm0, %v3073_v28 }
 0x283   :  { %4043 = vmatprep.mubr.msk.f32.mxu0 %vm833_vm0, %v3074_v62  ;;  %v3289_v1 = vpop.permute.xlu1 %3288  ;;  %v3284_v48 = vpop.permute.xlu0 %3283 }
 0x286   :  { %4044 = vmatmul.mubr.msk.f32.gmra.mxu0 %vm833_vm0, %v3075_v63 }
 0x287   :  { %4046 = vmatprep.mubr.msk.f32.mxu0 %vm833_vm0, %v3076_v19  ;;  %v3209_v46 = vpop.permute.xlu1 %3208  ;;  %v3279_v18 = vpop.permute.xlu0 %3278 }
 0x28a   :  { %4047 = vmatmul.mubr.msk.f32.gmra.mxu0 %vm833_vm0, %v3077_v4 }
 0x28b   :  { %4049 = vmatprep.mubr.msk.f32.mxu0 %vm833_vm0, %v3078_v51  ;;  %v3204_v11 = vpop.permute.xlu1 %3203  ;;  %v3274_v21 = vpop.permute.xlu0 %3273 }
 0x28e   :  { %4050 = vmatmul.mubr.msk.f32.gmra.mxu0 %vm833_vm0, %v3079_v37 }
 0x28f   :  { %4052 = vmatprep.mubr.msk.f32.mxu0 %vm833_vm0, %v3080_v47  ;;  %v3199_v55 = vpop.permute.xlu1 %3198  ;;  %v3269_v38 = vpop.permute.xlu0 %3268 }
 0x292   :  { %4053 = vmatmul.mubr.msk.f32.gmra.mxu0 %vm833_vm0, %v3081_v49 }
 0x293   :  { %4055 = vmatprep.mubr.msk.f32.mxu0 %vm833_vm0, %v3082_v57  ;;  %v3194_v8 = vpop.permute.xlu1 %3193  ;;  %v3264_v2 = vpop.permute.xlu0 %3263 }
 0x296   :  { %4056 = vmatmul.mubr.msk.f32.gmra.mxu0 %vm833_vm0, %v3083_v26 }
 0x297   :  { %4058 = vmatprep.mubr.msk.f32.mxu0 %vm833_vm0, %v3084_v44  ;;  %v3189_v39 = vpop.permute.xlu1 %3188  ;;  %v3259_v19 = vpop.permute.xlu0 %3258 }
 0x29a   :  { %4059 = vmatmul.mubr.msk.f32.gmra.mxu0 %vm833_vm0, %v3085_v24 }
 0x29b   :  { %4061 = vmatprep.mubr.msk.f32.mxu0 %vm833_vm0, %v3086_v59  ;;  %v3184_v28 = vpop.permute.xlu1 %3183  ;;  %v3254_v49 = vpop.permute.xlu0 %3253 }
 0x29e   :  { %4062 = vmatmul.mubr.msk.f32.gmra.mxu0 %vm833_vm0, %v3087_v23 }
 0x29f   :  { %4064 = vmatprep.mubr.msk.f32.mxu0 %vm833_vm0, %v3088_v30  ;;  %v3179_v51 = vpop.permute.xlu1 %3178  ;;  %v3249_v59 = vpop.permute.xlu0 %3248 }
 0x2a2   :  { %4065 = vmatmul.mubr.msk.f32.gmra.mxu0 %vm833_vm0, %v3089_v5 }
 0x2a3   :  { %4067 = vmatprep.mubr.msk.f32.mxu0 %vm833_vm0, %v3090_v45  ;;  %v3174_v26 = vpop.permute.xlu1 %3173 }
 0x2a6   :  { %4068 = vmatmul.mubr.msk.f32.gmra.mxu0 %vm833_vm0, %v3091_v58  ;;  %v3244_v58 = vpop.permute.xlu0 %3243 }
 0x2a7   :  { %4070 = vmatprep.mubr.msk.f32.mxu0 %vm833_vm0, %v3092_v54  ;;  %v3169_v30 = vpop.permute.xlu1 %3168 }
 0x2aa   :  { %4071 = vmatmul.mubr.msk.f32.gmra.mxu0 %vm833_vm0, %v3093_v35 }
 0x2ab   :  { %4073 = vmatprep.mubr.msk.f32.mxu0 %vm833_vm0, %v3094_v33  ;;  %v3164_v35 = vpop.permute.xlu1 %3163 }
 0x2ae   :  { %4074 = vmatmul.mubr.msk.f32.gmra.mxu0 %vm833_vm0, %v3095_v50 }
 0x2af   :  { %4076 = vmatprep.mubr.msk.f32.mxu0 %vm833_vm0, %v3096_v43  ;;  %v3159_v10 = vpop.permute.xlu1 %3158 }
 0x2b2   :  { %4077 = vmatmul.mubr.msk.f32.gmra.mxu0 %vm833_vm0, %v3097_v53 }
 0x2b3   :  { %4079 = vmatprep.mubr.msk.f32.mxu0 %vm833_vm0, %v3098_v6 }
 0x2b6   :  { %4080 = vmatmul.mubr.msk.f32.gmra.mxu0 %vm833_vm0, %v3099_v13 }
 0x2b7   :  { %4082 = vmatprep.mubr.msk.f32.mxu0 %vm833_vm0, %v3100_v25 }
 0x2ba   :  { %4083 = vmatmul.mubr.msk.f32.gmra.mxu0 %vm833_vm0, %v3101_v42 }
 0x2bb   :  { %4085 = vmatprep.mubr.msk.f32.mxu0 %vm833_vm0, %v3102_v31  ;;  %v3239_v31 = vpop.permute.xlu0 %3238 }
 0x2be   :  { %4086 = vmatmul.mubr.msk.f32.gmra.mxu0 %vm833_vm0, %v3103_v20 }
 0x342   :  { %v5681_v9 = vpop.f32.mrf.mxu0 }
 0x343   :  { %5748 = vst [vmem:[#allocation3_spill] sm:$0xff] %v5681_v9 }
 0x344   :  { %v5683_v12 = vpop.f32.mrf.mxu0 }
 0x345   :  { %5749 = vst [vmem:[#allocation4_spill] sm:$0xff] %v5683_v12 }
 0x346   :  { %v5685_v60 = vpop.f32.mrf.mxu0 }
 0x348   :  { %v5687_v15 = vpop.f32.mrf.mxu0 }
 0x349   :  { %5750 = vst [vmem:[#allocation5_spill] sm:$0xff] %v5687_v15 }
 0x34a   :  { %v5689_v3 = vpop.f32.mrf.mxu0 }
 0x34c   :  { %v5691_v56 = vpop.f32.mrf.mxu0 }
 0x34e   :  { %v5693_v22 = vpop.f32.mrf.mxu0 }
 0x350   :  { %v5695_v16 = vpop.f32.mrf.mxu0 }
 0x352   :  { %v5697_v61 = vpop.f32.mrf.mxu0 }
 0x354   :  { %v5699_v32 = vpop.f32.mrf.mxu0 }
 0x356   :  { %v4057_v0 = vpop.f32.mrf.mxu0 }
 0x358   :  { %v3508_v41 = vpop.f32.mrf.mxu0 }
 0x35a   :  { %v4060_v40 = vpop.f32.mrf.mxu0 }
 0x35b   :  { %v3524_v20 = vadd.f32 %v4060_v40, %v3204_v11  ;;  %v3154_v40 = vpop.permute.xlu1 %3153 }
 0x35c   :  { %v3518_v17 = vpop.f32.mrf.mxu0 }
 0x35d   :  { %v3519_v9 = vadd.f32 %v3518_v17, %v3199_v55  ;;  %v3504_v55 = vadd.f32 %v5697_v61, %v3184_v28 }
 0x35e   :  { %v4063_v27 = vpop.f32.mrf.mxu0 }
 0x35f   :  { %v3534_v33 = vadd.f32 %v4063_v27, %v3214_v7  ;;  %v3514_v7 = vadd.f32 %v4057_v0, %v3194_v8  ;;  %v3509_v27 = vadd.f32 %v3508_v41, %v3189_v39  ;;  %v3629_v11 = vmax.f32 %v3519_v9, 0.0 }
 0x360   :  { %v3528_v34 = vpop.f32.mrf.mxu0  ;;  %v3499_v0 = vadd.f32 %v5699_v32, %v3179_v51  ;;  %v3494_v41 = vadd.f32 %v5693_v22, %v3174_v26  ;;  %v3626_v39 = vmax.f32 %v3504_v55, 0.0 }
 0x361   :  { %v3529_v53 = vadd.f32 %v3528_v34, %v3209_v46  ;;  %v3632_v14 = vmax.f32 %v3534_v33, 0.0  ;;  %v3628_v17 = vmax.f32 %v3514_v7, 0.0  ;;  %v3627_v8 = vmax.f32 %v3509_v27, 0.0  ;;  %v5760_v7 = vld [vmem:[#allocation2_spill] sm:$0xff] }
 0x362   :  { %v5701_v36 = vpop.f32.mrf.mxu0  ;;  %v3625_v28 = vmax.f32 %v3499_v0, 0.0  ;;  %v3624_v51 = vmax.f32 %v3494_v41, 0.0 }
 0x363   :  { %5751 = vst [vmem:[#allocation6_spill] sm:$0xff] %v5701_v36  ;;  %v3631_v36 = vmax.f32 %v3529_v53, 0.0 }
 0x364   :  { %v5703_v52 = vpop.f32.mrf.mxu0 }
 0x365   :  { %5752 = vst [vmem:[#allocation7_spill] sm:$0xff] %v5703_v52 }
 0x366   :  { %v5705_v62 = vpop.f32.mrf.mxu0 }
 0x368   :  { %v5707_v63 = vpop.f32.mrf.mxu0 }
 0x369   :  { %5753 = vst [vmem:[#allocation8_spill] sm:$0xff] %v5707_v63 }
 0x36a   :  { %v5709_v4 = vpop.f32.mrf.mxu0 }
 0x36b   :  { %v3564_v32 = vadd.f32 %v5709_v4, %v3244_v58  ;;  %v3474_v4 = vadd.f32 %v5685_v60, %v3154_v40 }
 0x36c   :  { %v5711_v37 = vpop.f32.mrf.mxu0 }
 0x36d   :  { %v3559_v22 = vadd.f32 %v5711_v37, %v3239_v31  ;;  %v5755_v37 = vld [vmem:[#allocation5_spill] sm:$0xff]  ;;  %v3620_v33 = vmax.f32 %v3474_v4, 0.0 }
 0x36e   :  { %v4075_v47 = vpop.f32.mrf.mxu0 }
 0x370   :  { %v5713_v57 = vpop.f32.mrf.mxu0 }
 0x371   :  { %v3569_v61 = vadd.f32 %v5713_v57, %v3249_v59  ;;  %v3479_v57 = vadd.f32 %v5691_v56, %v3159_v10  ;;  %v5756_v10 = vld [vmem:[#allocation6_spill] sm:$0xff] }
 0x372   :  { %v4078_v44 = vpop.f32.mrf.mxu0 }
 0x374   :  { %v3578_v24 = vpop.f32.mrf.mxu0 }
 0x376   :  { %v4081_v23 = vpop.f32.mrf.mxu0 }
 0x377   :  { %v3594_v15 = vadd.f32 %v4081_v23, %v3274_v21  ;;  %v3579_v21 = vadd.f32 %v3578_v24, %v3259_v19  ;;  %v3484_v19 = vadd.f32 %v5689_v3, %v3164_v35  ;;  %v3638_v24 = vmax.f32 %v3564_v32, 0.0  ;;  %v5754_v3 = vld [vmem:[#allocation8_spill] sm:$0xff] }
 0x378   :  { %v3588_v5 = vpop.f32.mrf.mxu0 }
 0x379   :  { %v3589_v46 = vadd.f32 %v3588_v5, %v3269_v38  ;;  %v3644_v34 = vmax.f32 %v3594_v15, 0.0  ;;  %v3149_v15 = vpop.permute.xlu1 %3148  ;;  %v3622_v59 = vmax.f32 %v3484_v19, 0.0 }
 0x37a   :  { %v4084_v45 = vpop.f32.mrf.mxu0  ;;  %v3469_v5 = vadd.f32 %v5755_v37, %v3149_v15 }
 0x37b   :  { %v3604_v13 = vadd.f32 %v4084_v45, %v3284_v48  ;;  %v3621_v45 = vmax.f32 %v3479_v57, 0.0 }
 0x37c   :  { %v3598_v54 = vpop.f32.mrf.mxu0 }
 0x37d   :  { %v3599_v12 = vadd.f32 %v3598_v54, %v3279_v18  ;;  %v3646_v63 = vmax.f32 %v3604_v13, 0.0  ;;  %v3584_v18 = vadd.f32 %v4078_v44, %v3264_v2  ;;  %v3489_v2 = vadd.f32 %v5695_v16, %v3169_v30  ;;  %v3144_v16 = vpop.permute.xlu1 %3143 }
 0x37e   :  { %v4087_v50 = vpop.f32.mrf.mxu0  ;;  %v3637_v30 = vmax.f32 %v3559_v22, 0.0 }
 0x37f   :  { %v3614_v43 = vadd.f32 %v4087_v50, %v3294_v29  ;;  %v3630_v29 = vmax.f32 %v3524_v20, 0.0  ;;  %v3645_v48 = vmax.f32 %v3599_v12, 0.0  ;;  %v3574_v12 = vadd.f32 %v4075_v47, %v3254_v49  ;;  %v5758_v50 = vld [vmem:[#allocation7_spill] sm:$0xff] }
 0x380   :  { %v3608_v6 = vpop.f32.mrf.mxu0  ;;  %v3642_v38 = vmax.f32 %v3584_v18, 0.0  ;;  %v3639_v47 = vmax.f32 %v3569_v61, 0.0  ;;  %v3623_v26 = vmax.f32 %v3489_v2, 0.0 }
 0x381   :  { %v3648_v25 = vmax.f32 %v3614_v43, 0.0  ;;  %v3609_v42 = vadd.f32 %v3608_v6, %v3289_v1  ;;  %v3234_v1 = vpop.permute.xlu0 %3233  ;;  %v3139_v60 = vpop.permute.xlu1 %3138  ;;  %v5759_v6 = vld [vmem:[#allocation4_spill] sm:$0xff] }
 0x382   :  { %v3554_v44 = vadd.f32 %v5705_v62, %v3234_v1  ;;  %v5757_v62 = vld [vmem:[#allocation3_spill] sm:$0xff]  ;;  %v3459_v13 = vadd.f32 %v5759_v6, %v3139_v60 }
 0x383   :  { %v3647_v52 = vmax.f32 %v3609_v42, 0.0  ;;  %3997 = vmatprep.subr.mxu1 %v3648_v25  ;;  %v3464_v35 = vadd.f32 %v5757_v62, %v3144_v16  ;;  %v3619_v25 = vmax.f32 %v3469_v5, 0.0 }
 0x384   :  { %3998 = vmatpush3.msra.mxu1 %v3632_v14  ;;  %v3636_v58 = vmax.f32 %v3554_v44, 0.0  ;;  %v3617_v14 = vmax.f32 %v3459_v13, 0.0 }
 0x385   :  { %3999 = vmatprep.subr.mxu1 %v3647_v52  ;;  %v3643_v52 = vmax.f32 %v3589_v46, 0.0  ;;  %v3229_v9 = vpop.permute.xlu0 %3228  ;;  %v3618_v31 = vmax.f32 %v3464_v35, 0.0 }
 0x386   :  { %4000 = vmatpush3.msra.mxu1 %v3631_v36  ;;  %v3641_v36 = vmax.f32 %v3579_v21, 0.0  ;;  %v3549_v23 = vadd.f32 %v5754_v3, %v3229_v9 }
 0x387   :  { %4001 = vmatprep.subr.mxu1 %v3646_v63  ;;  %v3640_v63 = vmax.f32 %v3574_v12, 0.0 }
 0x388   :  { %4002 = vmatpush3.msra.mxu1 %v3630_v29  ;;  %v3635_v53 = vmax.f32 %v3549_v23, 0.0 }
 0x389   :  { %4003 = vmatprep.subr.mxu1 %v3645_v48  ;;  %v3224_v49 = vpop.permute.xlu0 %3223 }
 0x38a   :  { %4004 = vmatpush3.msra.mxu1 %v3629_v11  ;;  %v3544_v56 = vadd.f32 %v5756_v10, %v3224_v49 }
 0x38b   :  { %4005 = vmatprep.subr.mxu1 %v3644_v34 }
 0x38c   :  { %4006 = vmatpush3.msra.mxu1 %v3628_v17  ;;  %v3634_v42 = vmax.f32 %v3544_v56, 0.0 }
 0x38d   :  { %4007 = vmatprep.subr.mxu1 %v3643_v52  ;;  %v3219_v54 = vpop.permute.xlu0 %3218 }
 0x38e   :  { %4008 = vmatpush3.msra.mxu1 %v3627_v8  ;;  %v3539_v43 = vadd.f32 %v5758_v50, %v3219_v54 }
 0x38f   :  { %4009 = vmatprep.subr.mxu1 %v3642_v38 }
 0x390   :  { %4010 = vmatpush3.msra.mxu1 %v3626_v39  ;;  %v3633_v20 = vmax.f32 %v3539_v43, 0.0 }
 0x391   :  { %4011 = vmatprep.subr.mxu1 %v3641_v36  ;;  %v3654_v1 = vpop.permute.xlu0 %3653 }
 0x392   :  { %4012 = vmatpush3.msra.mxu1 %v3625_v28 }
 0x393   :  { %4013 = vmatprep.subr.mxu1 %v3640_v63 }
 0x394   :  { %4014 = vmatpush3.msra.mxu1 %v3624_v51 }
 0x395   :  { %4015 = vmatprep.subr.mxu1 %v3639_v47 }
 0x396   :  { %4016 = vmatpush3.msra.mxu1 %v3623_v26 }
 0x397   :  { %4017 = vmatprep.subr.mxu1 %v3638_v24 }
 0x398   :  { %4018 = vmatpush3.msra.mxu1 %v3622_v59 }
 0x399   :  { %4019 = vmatprep.subr.mxu1 %v3637_v30 }
 0x39a   :  { %4020 = vmatpush3.msra.mxu1 %v3621_v45 }
 0x39b   :  { %4021 = vmatprep.subr.mxu1 %v3636_v58 }
 0x39c   :  { %4022 = vmatpush3.msra.mxu1 %v3620_v33 }
 0x39d   :  { %4023 = vmatprep.subr.mxu1 %v3635_v53 }
 0x39e   :  { %4024 = vmatpush3.msra.mxu1 %v3619_v25 }
 0x39f   :  { %4025 = vmatprep.subr.mxu1 %v3634_v42 }
 0x3a0   :  { %4026 = vmatpush3.msra.mxu1 %v3618_v31 }
 0x3a1   :  { %4027 = vmatprep.subr.mxu1 %v3633_v20 }
 0x3a2   :  { %4028 = vmatpush3.msra.mxu1 %v3617_v14 }
 0x3a3   :  { %3724 = vmatmul.mubr.f32.vlgmr.msra.gmra.mxu1 %v5760_v7 }
 0x463   :  { %v4029_v29 = vpop.f32.mrf.mxu1 }
 0x465   :  { %v4030_v46 = vpop.f32.mrf.mxu1 }
 0x466   :  { %v4031_v48 = vadd.f32 %v4030_v46, %v4029_v29 }
 0x468   :  { %v3726_v27 = vadd.f32 %v4031_v48, %v3654_v1 }
 0x46a   :  { %3730 = vst.msk [vmem:[%s5743_s7] sm:$0x7] %vm3729_vm3, %v3726_v27 }

</bundles_post_ra>
